<compile_context>
chip_gen: v6e
topology: v6e:2x2x1
jax: 0.10.0
libtpu: 0.0.40
codegen_flags: <defaults>
</compile_context>

<pallas_src>
import functools

import jax
import jax.numpy as jnp
from jax.experimental import pallas as pl
from jax.experimental.pallas import tpu as pltpu


# ---------------------------------------------------------------------------
# Fused kernel: all layers, both directions, full time loop in one invocation.
# ---------------------------------------------------------------------------
def _fused_lstm_kernel(*refs, seq_len, batch_pad, hidden, in_features,
                       num_layers, bidirectional):
    T, Bp, H, I0 = seq_len, batch_pad, hidden, in_features
    D = 2 if bidirectional else 1
    DH = D * H
    G = 4 * DH

    x_ref = refs[0]                               # (Bp, T*I0) lane-dense input
    w_refs = refs[1:1 + 3 * num_layers]           # (wih, whh, bias) per layer (fused)
    out_ref = refs[1 + 3 * num_layers]            # (Bp, T*H) lane-dense output

    if bidirectional:
        # Gate-major fused layout: [i_f,i_b,f_f,f_b,g_f,g_b,o_f,o_b]; within each
        # D*H-wide gate block the first H lanes belong to the forward direction.
        g_lanes = jax.lax.broadcasted_iota(jnp.int32, (1, G), 1)
        fwd_mask = (g_lanes % DH) < H
        dh_lanes = jax.lax.broadcasted_iota(jnp.int32, (1, DH), 1)
        half_fwd = dh_lanes < H                   # fwd half of an h vector

    # Batch-major lane-dense input -> time-major rows. All pieces are Bp (=8k) rows,
    # so the row-concat is sublane-tile aligned; this runs once, off the serial path.
    x_bt = x_ref[...].astype(jnp.float32)
    layer_in = jnp.concatenate(
        [x_bt[:, s * I0:(s + 1) * I0] for s in range(T)], axis=0)   # (T*Bp, I0)

    out_val = None
    for l in range(num_layers):
        wih = w_refs[3 * l][...]                  # (Iin, G)
        whh = w_refs[3 * l + 1][...]              # (DH, G)  block-diag per direction
        bias = w_refs[3 * l + 2][...]             # (1, G)
        last = (l == num_layers - 1)

        # Hoisted input projection for all timesteps: one MXU pass per layer.
        # TODO(synk): cast MXU operands to bf16 on v6e/v7x (native MXU dtype) once the
        # accuracy budget is confirmed; kept f32 to match the PyTorch f32 reference.
        gx = jnp.dot(layer_in, wih, preferred_element_type=jnp.float32) + bias

        # Pre-slice (and direction-merge) the per-step gate inputs.  These depend only
        # on gx, not on the recurrence, so they stay off the serial critical path.
        gx_steps = []
        for s in range(T):
            g_f = gx[s * Bp:(s + 1) * Bp, :]                   # fwd uses time s
            if bidirectional:
                g_b = gx[(T - 1 - s) * Bp:(T - s) * Bp, :]     # bwd uses time T-1-s
                gx_steps.append(jnp.where(fwd_mask, g_f, g_b))
            else:
                gx_steps.append(g_f)

        h = jnp.zeros((Bp, DH), jnp.float32)
        c = jnp.zeros((Bp, DH), jnp.float32)
        h_steps = []

        # T is small & static -> fully unrolled recurrence with static indices.
        # (Switch to lax.fori_loop with partial unroll if T grows.)
        for s in range(T):
            # TODO(synk): drive the MXU explicitly (matmul_push_rhs once per layer,
            # matmul_acc_lhs per step) if the bundle dump shows whh being re-pushed.
            gates = gx_steps[s] + jnp.dot(h, whh, preferred_element_type=jnp.float32)

            # Single full-width sigmoid; g-gate uses tanh(x) = 2*sigmoid(2x) - 1
            # (its columns in wih/whh/bias were pre-scaled by 2).
            sig = jax.nn.sigmoid(gates)
            i_g = sig[:, 0 * DH:1 * DH]
            f_g = sig[:, 1 * DH:2 * DH]
            g_g = 2.0 * sig[:, 2 * DH:3 * DH] - 1.0
            o_g = sig[:, 3 * DH:4 * DH]

            c = f_g * c + i_g * g_g
            h = o_g * jnp.tanh(c)
            h_steps.append(h)

        if last:
            if bidirectional:
                # (fwd[t] + flip(bwd, time)[t]) / 2 == (h_f(step t) + h_b(step t)) / 2
                merged = [(h_steps[t][:, :H] + h_steps[t][:, H:DH]) * 0.5
                          for t in range(T)]
            else:
                merged = h_steps
            out_val = jnp.concatenate(merged, axis=1)          # (Bp, T*H) lane-dense
        else:
            if bidirectional:
                # torch layout for the next layer: act[t] = [fwd[t], bwd[t]], with
                # bwd[t] produced at step T-1-t.  Single vreg select per timestep.
                rows = [jnp.where(half_fwd, h_steps[t], h_steps[T - 1 - t])
                        for t in range(T)]
            else:
                rows = h_steps
            layer_in = jnp.concatenate(rows, axis=0)           # (T*Bp, DH), aligned

    # One dense, lane-aligned store for the whole output.
    out_ref[...] = out_val.astype(out_ref.dtype)
    # TODO(synk): on v7x, shard the two directions (or the batch) across the 2
    # TensorCores via pl.core_map + VMEM_SHARED/CMEM handoff between layers.


# ---------------------------------------------------------------------------
# Weight fusion helpers (PyTorch (4H, Iin)/(4H, H) layout -> gate-major fused)
# ---------------------------------------------------------------------------
def _fuse_layer_weights(w_ih_list, w_hh_list, b_ih_list, b_hh_list, H):
    """Build fused, transposed, gate-major weights for one layer.

    Column layout of the G = 4*D*H gate axis: [i_f,i_b,f_f,f_b,g_f,g_b,o_f,o_b].
    whh is block-diagonal over directions so h_cat=[h_f,h_b] drives one matmul.
    The g-gate columns are pre-scaled by 2 so the kernel can use
    tanh(x) = 2*sigmoid(2x) - 1 with a single full-width sigmoid pass.
    """
    D = len(w_ih_list)
    Iin = w_ih_list[0].shape[1]
    G = 4 * D * H
    wih = jnp.zeros((Iin, G), jnp.float32)
    whh = jnp.zeros((D * H, G), jnp.float32)
    bias = jnp.zeros((1, G), jnp.float32)
    for k in range(4):                      # gate order i, f, g, o
        scale = 2.0 if k == 2 else 1.0      # pre-scale g-gate for the tanh identity
        for d in range(D):
            col = k * D * H + d * H
            wih = wih.at[:, col:col + H].set(
                scale * jnp.transpose(
                    w_ih_list[d][k * H:(k + 1) * H, :]).astype(jnp.float32))
            whh = whh.at[d * H:(d + 1) * H, col:col + H].set(
                scale * jnp.transpose(
                    w_hh_list[d][k * H:(k + 1) * H, :]).astype(jnp.float32))
            bias = bias.at[0, col:col + H].set(
                scale * (b_ih_list[d][k * H:(k + 1) * H]
                         + b_hh_list[d][k * H:(k + 1) * H]).astype(jnp.float32))
    return wih, whh, bias


# ---------------------------------------------------------------------------
# Module-level forward (single pallas_call)
# ---------------------------------------------------------------------------
def lstm_module_forward(x, params, *, hidden_dim, num_layers, bidirectional):
    """Equivalent of LSTM.forward: x[B, T, *feat] -> (B, T, hidden_dim)."""
    B, T = x.shape[0], x.shape[1]
    x = x.reshape(B, T, -1).astype(jnp.float32)        # flatten per-step features
    I0 = x.shape[-1]
    Bp = ((B + 7) // 8) * 8                            # pad batch rows to sublane tile

    # Lane-dense batch-major layout; time-major relayout happens inside the kernel.
    x_bt = x.reshape(B, T * I0)
    if Bp != B:
        x_bt = jnp.zeros((Bp, T * I0), jnp.float32).at[:B].set(x_bt)

    H = hidden_dim
    D = 2 if bidirectional else 1
    DH = D * H
    G = 4 * DH

    fused = []
    dirs = ["f", "b"] if bidirectional else ["f"]
    for l in range(num_layers):
        p = params[l]
        wih, whh, bias = _fuse_layer_weights(
            [p[f"w_ih_{d}"] for d in dirs], [p[f"w_hh_{d}"] for d in dirs],
            [p[f"b_ih_{d}"] for d in dirs], [p[f"b_hh_{d}"] for d in dirs], H)
        fused += [wih, whh, bias]

    kernel = functools.partial(
        _fused_lstm_kernel, seq_len=T, batch_pad=Bp, hidden=H, in_features=I0,
        num_layers=num_layers, bidirectional=bidirectional)

    in_arrays = (x_bt, *fused)
    in_specs = [pl.BlockSpec(a.shape, lambda i: (0, 0)) for a in in_arrays]

    # Advisory cost estimate for the XLA scheduler.
    flops = 0
    transcendentals = 0
    i_in = I0
    for _ in range(num_layers):
        flops += 2 * T * Bp * i_in * G          # hoisted input projection
        flops += 2 * T * Bp * DH * G            # recurrent matmul
        flops += 12 * T * Bp * DH               # gate / state elementwise
        transcendentals += T * Bp * (G + DH)    # sigmoid(gates) + tanh(c)
        i_in = DH
    bytes_accessed = sum(int(a.size) * 4 for a in in_arrays) + Bp * T * H * 4

    out = pl.pallas_call(
        kernel,
        out_shape=jax.ShapeDtypeStruct((Bp, T * H), jnp.float32),
        grid_spec=pltpu.PrefetchScalarGridSpec(
            num_scalar_prefetch=0,
            grid=(1,),
            in_specs=in_specs,
            out_specs=pl.BlockSpec((Bp, T * H), lambda i: (0, 0)),
        ),
        compiler_params=pltpu.CompilerParams(
            dimension_semantics=("arbitrary",)),
        cost_estimate=pl.CostEstimate(
            flops=int(flops), transcendentals=int(transcendentals),
            bytes_accessed=int(bytes_accessed)),
    )(*in_arrays)

    # Free slice + reshape (no post-kernel transpose): row b, lanes [t*H:(t+1)*H].
    return out[:B].reshape(B, T, H)


# ---------------------------------------------------------------------------
# Pure-JAX reference (independent of the fused-weight construction)
# ---------------------------------------------------------------------------
def _ref_layer_dir(x_tbi, w_ih, w_hh, b_ih, b_hh):
    T, B, I = x_tbi.shape
    H = w_hh.shape[1]
    bias = b_ih + b_hh

    def step(carry, x_t):
        h, c = carry
        gates = x_t @ w_ih.T + h @ w_hh.T + bias
        i = jax.nn.sigmoid(gates[:, 0 * H:1 * H])
        f = jax.nn.sigmoid(gates[:, 1 * H:2 * H])
        g = jnp.tanh(gates[:, 2 * H:3 * H])
        o = jax.nn.sigmoid(gates[:, 3 * H:4 * H])
        c = f * c + i * g
        h = o * jnp.tanh(c)
        return (h, c), h

    init = (jnp.zeros((B, H), jnp.float32), jnp.zeros((B, H), jnp.float32))
    _, ys = jax.lax.scan(step, init, x_tbi)
    return ys


def _ref_forward(x, params, *, hidden_dim, num_layers, bidirectional):
    B, T = x.shape[0], x.shape[1]
    x = x.reshape(B, T, -1).astype(jnp.float32)
    layer_in = jnp.transpose(x, (1, 0, 2))
    for l in range(num_layers):
        p = params[l]
        fwd = _ref_layer_dir(layer_in, p["w_ih_f"], p["w_hh_f"], p["b_ih_f"], p["b_hh_f"])
        if bidirectional:
            bwd = _ref_layer_dir(layer_in[::-1], p["w_ih_b"], p["w_hh_b"],
                                 p["b_ih_b"], p["b_hh_b"])[::-1]
            layer_in = jnp.concatenate([fwd, bwd], axis=-1)
        else:
            layer_in = fwd
    out = jnp.transpose(layer_in, (1, 0, 2))
    if bidirectional:
        out = (out[:, :, :hidden_dim] + out[:, ::-1, hidden_dim:]) / 2.0
    return out


# ---------------------------------------------------------------------------
# Deterministic parameter init (same shapes as nn.LSTM: uniform(-1/sqrt(H), ..))
# ---------------------------------------------------------------------------
def init_lstm_params(key, input_size, hidden_dim, num_layers, bidirectional):
    params = []
    k = 1.0 / jnp.sqrt(hidden_dim)
    directions = ["f", "b"] if bidirectional else ["f"]
    for l in range(num_layers):
        layer_in = input_size if l == 0 else hidden_dim * (2 if bidirectional else 1)
        layer_p = {}
        for d in directions:
            key, k1, k2, k3, k4 = jax.random.split(key, 5)
            layer_p[f"w_ih_{d}"] = jax.random.uniform(
                k1, (4 * hidden_dim, layer_in), jnp.float32, -k, k)
            layer_p[f"w_hh_{d}"] = jax.random.uniform(
                k2, (4 * hidden_dim, hidden_dim), jnp.float32, -k, k)
            layer_p[f"b_ih_{d}"] = jax.random.uniform(
                k3, (4 * hidden_dim,), jnp.float32, -k, k)
            layer_p[f"b_hh_{d}"] = jax.random.uniform(
                k4, (4 * hidden_dim,), jnp.float32, -k, k)
        params.append(layer_p)
    return params


if __name__ == "__main__":
    # Module config (mirrors LSTM.__init__ arguments)
    input_shape = (4, 4)          # per-timestep feature shape -> flattened to 16
    lstm_config = {"hidden_dim": 32, "num_layers": 2, "is_bidirectional": True}
    regularization_config = {"dropout": 0}

    hidden_dim = lstm_config["hidden_dim"]
    num_layers = lstm_config["num_layers"]
    bidirectional = lstm_config["is_bidirectional"]
    input_size = int(input_shape[0] * input_shape[1])

    batch, seq = 2, 8
    key = jax.random.PRNGKey(0)
    key, xk, pk = jax.random.split(key, 3)
    x = jax.random.normal(xk, (batch, seq) + input_shape, jnp.float32)

    params = init_lstm_params(pk, input_size, hidden_dim, num_layers, bidirectional)

    out = lstm_module_forward(x, params, hidden_dim=hidden_dim,
                              num_layers=num_layers, bidirectional=bidirectional)
    out = jax.block_until_ready(out)

    assert out.shape == (batch, seq, hidden_dim), out.shape

    ref = _ref_forward(x, params, hidden_dim=hidden_dim,
                       num_layers=num_layers, bidirectional=bidirectional)
    ref = jax.block_until_ready(ref)
    assert jnp.allclose(out, ref, rtol=1e-3, atol=1e-3), \
        float(jnp.max(jnp.abs(out - ref)))

    print("KERNEL_OK")
</pallas_src>

<mosaic_0001>
module attributes {stable_mosaic.version = 11 : i64} {
  func.func @_fused_lstm_kernel(%arg0: i32, %arg1: memref<8x128xf32, #tpu.memory_space<vmem>>, %arg2: memref<16x256xf32, #tpu.memory_space<vmem>>, %arg3: memref<64x256xf32, #tpu.memory_space<vmem>>, %arg4: memref<1x256xf32, #tpu.memory_space<vmem>>, %arg5: memref<64x256xf32, #tpu.memory_space<vmem>>, %arg6: memref<64x256xf32, #tpu.memory_space<vmem>>, %arg7: memref<1x256xf32, #tpu.memory_space<vmem>>, %arg8: memref<8x256xf32, #tpu.memory_space<vmem>>) attributes {dimension_semantics = [#tpu.dimension_semantics<arbitrary>], iteration_bounds = array<i64: 1>, scalar_prefetch = 0 : i64, scratch_operands = 0 : i64, tpu.core_type = #tpu.core_type<tc>, window_params = [{pipeline_mode = #tpu.pipeline_mode<synchronous>, transform_indices = @transform_0, window_bounds = array<i64: 8, 128>}, {pipeline_mode = #tpu.pipeline_mode<synchronous>, transform_indices = @transform_1, window_bounds = array<i64: 16, 256>}, {pipeline_mode = #tpu.pipeline_mode<synchronous>, transform_indices = @transform_2, window_bounds = array<i64: 64, 256>}, {pipeline_mode = #tpu.pipeline_mode<synchronous>, transform_indices = @transform_3, window_bounds = array<i64: 1, 256>}, {pipeline_mode = #tpu.pipeline_mode<synchronous>, transform_indices = @transform_4, window_bounds = array<i64: 64, 256>}, {pipeline_mode = #tpu.pipeline_mode<synchronous>, transform_indices = @transform_5, window_bounds = array<i64: 64, 256>}, {pipeline_mode = #tpu.pipeline_mode<synchronous>, transform_indices = @transform_6, window_bounds = array<i64: 1, 256>}, {pipeline_mode = #tpu.pipeline_mode<synchronous>, transform_indices = @transform_7, window_bounds = array<i64: 8, 256>}]} {
    %0 = tpu.iota {dimensions = array<i32: 1>} : vector<1x256xi32>
    %c64_i32 = arith.constant 64 : i32
    %c0_i32 = arith.constant 0 : i32
    %1 = arith.cmpi eq, %c64_i32, %c0_i32 : i32
    %c1_i32 = arith.constant 1 : i32
    %2 = arith.select %1, %c1_i32, %c64_i32 : i32
    %3 = vector.broadcast %2 : i32 to vector<1x256xi32>
    %4 = arith.remsi %0, %3 : vector<1x256xi32>
    %c0_i32_0 = arith.constant 0 : i32
    %5 = vector.broadcast %c0_i32_0 : i32 to vector<1x256xi32>
    %6 = arith.cmpi ne, %4, %5 : vector<1x256xi32>
    %c0_i32_1 = arith.constant 0 : i32
    %7 = vector.broadcast %c0_i32_1 : i32 to vector<1x256xi32>
    %8 = arith.cmpi slt, %4, %7 : vector<1x256xi32>
    %c0_i32_2 = arith.constant 0 : i32
    %9 = arith.cmpi slt, %2, %c0_i32_2 : i32
    %10 = vector.broadcast %9 : i1 to vector<1x256xi1>
    %11 = vector.broadcast %10 : vector<1x256xi1> to vector<1x256xi1>
    %12 = arith.xori %8, %11 : vector<1x256xi1>
    %13 = arith.andi %12, %6 : vector<1x256xi1>
    %14 = vector.broadcast %2 : i32 to vector<1x256xi32>
    %15 = arith.addi %4, %14 : vector<1x256xi32>
    %16 = arith.select %13, %15, %4 : vector<1x256xi1>, vector<1x256xi32>
    %c32_i32 = arith.constant 32 : i32
    %17 = vector.broadcast %c32_i32 : i32 to vector<1x256xi32>
    %18 = arith.cmpi slt, %16, %17 : vector<1x256xi32>
    %19 = tpu.iota {dimensions = array<i32: 1>} : vector<1x64xi32>
    %c32_i32_3 = arith.constant 32 : i32
    %20 = vector.broadcast %c32_i32_3 : i32 to vector<1x64xi32>
    %21 = arith.cmpi slt, %19, %20 : vector<1x64xi32>
    %c0 = arith.constant 0 : index
    %c0_4 = arith.constant 0 : index
    %22 = vector.load %arg1[%c0, %c0_4] : memref<8x128xf32, #tpu.memory_space<vmem>>, vector<8x128xf32>
    %23 = vector.extract_strided_slice %22 {offsets = [0, 0], sizes = [8, 16], strides = [1, 1]} : vector<8x128xf32> to vector<8x16xf32>
    %24 = vector.extract_strided_slice %22 {offsets = [0, 16], sizes = [8, 16], strides = [1, 1]} : vector<8x128xf32> to vector<8x16xf32>
    %25 = vector.extract_strided_slice %22 {offsets = [0, 32], sizes = [8, 16], strides = [1, 1]} : vector<8x128xf32> to vector<8x16xf32>
    %26 = vector.extract_strided_slice %22 {offsets = [0, 48], sizes = [8, 16], strides = [1, 1]} : vector<8x128xf32> to vector<8x16xf32>
    %27 = vector.extract_strided_slice %22 {offsets = [0, 64], sizes = [8, 16], strides = [1, 1]} : vector<8x128xf32> to vector<8x16xf32>
    %28 = vector.extract_strided_slice %22 {offsets = [0, 80], sizes = [8, 16], strides = [1, 1]} : vector<8x128xf32> to vector<8x16xf32>
    %29 = vector.extract_strided_slice %22 {offsets = [0, 96], sizes = [8, 16], strides = [1, 1]} : vector<8x128xf32> to vector<8x16xf32>
    %30 = vector.extract_strided_slice %22 {offsets = [0, 112], sizes = [8, 16], strides = [1, 1]} : vector<8x128xf32> to vector<8x16xf32>
    %31 = tpu.concatenate %23, %24, %25, %26, %27, %28, %29, %30 in 0 : vector<8x16xf32>, vector<8x16xf32>, vector<8x16xf32>, vector<8x16xf32>, vector<8x16xf32>, vector<8x16xf32>, vector<8x16xf32>, vector<8x16xf32> -> vector<64x16xf32>
    %c0_5 = arith.constant 0 : index
    %c0_6 = arith.constant 0 : index
    %32 = vector.load %arg2[%c0_5, %c0_6] : memref<16x256xf32, #tpu.memory_space<vmem>>, vector<16x256xf32>
    %c0_7 = arith.constant 0 : index
    %c0_8 = arith.constant 0 : index
    %33 = vector.load %arg3[%c0_7, %c0_8] : memref<64x256xf32, #tpu.memory_space<vmem>>, vector<64x256xf32>
    %c0_9 = arith.constant 0 : index
    %c0_10 = arith.constant 0 : index
    %34 = vector.load %arg4[%c0_9, %c0_10] : memref<1x256xf32, #tpu.memory_space<vmem>>, vector<1x256xf32>
    %cst = arith.constant dense<0.000000e+00> : vector<64x256xf32>
    %35 = tpu.matmul %31, %32, %cst {dimension_numbers = #tpu.dot_dimension_numbers<[1], [0], [0], [1], [0, 0, 1, 1], [], []>} : vector<64x16xf32>, vector<16x256xf32>, vector<64x256xf32> -> vector<64x256xf32>
    %36 = vector.broadcast %34 : vector<1x256xf32> to vector<64x256xf32>
    %37 = arith.addf %35, %36 : vector<64x256xf32>
    %38 = vector.extract_strided_slice %37 {offsets = [0, 0], sizes = [8, 256], strides = [1, 1]} : vector<64x256xf32> to vector<8x256xf32>
    %39 = vector.extract_strided_slice %37 {offsets = [56, 0], sizes = [8, 256], strides = [1, 1]} : vector<64x256xf32> to vector<8x256xf32>
    %40 = vector.shape_cast %18 : vector<1x256xi1> to vector<1x256xi1>
    %41 = vector.broadcast %40 : vector<1x256xi1> to vector<8x256xi1>
    %42 = arith.select %41, %38, %39 : vector<8x256xi1>, vector<8x256xf32>
    %43 = vector.extract_strided_slice %37 {offsets = [8, 0], sizes = [8, 256], strides = [1, 1]} : vector<64x256xf32> to vector<8x256xf32>
    %44 = vector.extract_strided_slice %37 {offsets = [48, 0], sizes = [8, 256], strides = [1, 1]} : vector<64x256xf32> to vector<8x256xf32>
    %45 = vector.shape_cast %18 : vector<1x256xi1> to vector<1x256xi1>
    %46 = vector.broadcast %45 : vector<1x256xi1> to vector<8x256xi1>
    %47 = arith.select %46, %43, %44 : vector<8x256xi1>, vector<8x256xf32>
    %48 = vector.extract_strided_slice %37 {offsets = [16, 0], sizes = [8, 256], strides = [1, 1]} : vector<64x256xf32> to vector<8x256xf32>
    %49 = vector.extract_strided_slice %37 {offsets = [40, 0], sizes = [8, 256], strides = [1, 1]} : vector<64x256xf32> to vector<8x256xf32>
    %50 = vector.shape_cast %18 : vector<1x256xi1> to vector<1x256xi1>
    %51 = vector.broadcast %50 : vector<1x256xi1> to vector<8x256xi1>
    %52 = arith.select %51, %48, %49 : vector<8x256xi1>, vector<8x256xf32>
    %53 = vector.extract_strided_slice %37 {offsets = [24, 0], sizes = [8, 256], strides = [1, 1]} : vector<64x256xf32> to vector<8x256xf32>
    %54 = vector.extract_strided_slice %37 {offsets = [32, 0], sizes = [8, 256], strides = [1, 1]} : vector<64x256xf32> to vector<8x256xf32>
    %55 = vector.shape_cast %18 : vector<1x256xi1> to vector<1x256xi1>
    %56 = vector.broadcast %55 : vector<1x256xi1> to vector<8x256xi1>
    %57 = arith.select %56, %53, %54 : vector<8x256xi1>, vector<8x256xf32>
    %58 = vector.extract_strided_slice %37 {offsets = [32, 0], sizes = [8, 256], strides = [1, 1]} : vector<64x256xf32> to vector<8x256xf32>
    %59 = vector.extract_strided_slice %37 {offsets = [24, 0], sizes = [8, 256], strides = [1, 1]} : vector<64x256xf32> to vector<8x256xf32>
    %60 = vector.shape_cast %18 : vector<1x256xi1> to vector<1x256xi1>
    %61 = vector.broadcast %60 : vector<1x256xi1> to vector<8x256xi1>
    %62 = arith.select %61, %58, %59 : vector<8x256xi1>, vector<8x256xf32>
    %63 = vector.extract_strided_slice %37 {offsets = [40, 0], sizes = [8, 256], strides = [1, 1]} : vector<64x256xf32> to vector<8x256xf32>
    %64 = vector.extract_strided_slice %37 {offsets = [16, 0], sizes = [8, 256], strides = [1, 1]} : vector<64x256xf32> to vector<8x256xf32>
    %65 = vector.shape_cast %18 : vector<1x256xi1> to vector<1x256xi1>
    %66 = vector.broadcast %65 : vector<1x256xi1> to vector<8x256xi1>
    %67 = arith.select %66, %63, %64 : vector<8x256xi1>, vector<8x256xf32>
    %68 = vector.extract_strided_slice %37 {offsets = [48, 0], sizes = [8, 256], strides = [1, 1]} : vector<64x256xf32> to vector<8x256xf32>
    %69 = vector.extract_strided_slice %37 {offsets = [8, 0], sizes = [8, 256], strides = [1, 1]} : vector<64x256xf32> to vector<8x256xf32>
    %70 = vector.shape_cast %18 : vector<1x256xi1> to vector<1x256xi1>
    %71 = vector.broadcast %70 : vector<1x256xi1> to vector<8x256xi1>
    %72 = arith.select %71, %68, %69 : vector<8x256xi1>, vector<8x256xf32>
    %73 = vector.extract_strided_slice %37 {offsets = [56, 0], sizes = [8, 256], strides = [1, 1]} : vector<64x256xf32> to vector<8x256xf32>
    %74 = vector.extract_strided_slice %37 {offsets = [0, 0], sizes = [8, 256], strides = [1, 1]} : vector<64x256xf32> to vector<8x256xf32>
    %75 = vector.shape_cast %18 : vector<1x256xi1> to vector<1x256xi1>
    %76 = vector.broadcast %75 : vector<1x256xi1> to vector<8x256xi1>
    %77 = arith.select %76, %73, %74 : vector<8x256xi1>, vector<8x256xf32>
    %cst_11 = arith.constant 0.000000e+00 : f32
    %78 = vector.broadcast %cst_11 : f32 to vector<8x64xf32>
    %cst_12 = arith.constant 0.000000e+00 : f32
    %79 = vector.broadcast %cst_12 : f32 to vector<8x64xf32>
    %cst_13 = arith.constant dense<0.000000e+00> : vector<8x256xf32>
    %80 = tpu.matmul %78, %33, %cst_13 {dimension_numbers = #tpu.dot_dimension_numbers<[1], [0], [0], [1], [0, 0, 1, 1], [], []>} : vector<8x64xf32>, vector<64x256xf32>, vector<8x256xf32> -> vector<8x256xf32>
    %81 = arith.addf %42, %80 : vector<8x256xf32>
    %82 = arith.negf %81 : vector<8x256xf32>
    %83 = math.exp %82 : vector<8x256xf32>
    %cst_14 = arith.constant 1.000000e+00 : f32
    %84 = vector.broadcast %cst_14 : f32 to vector<8x256xf32>
    %85 = arith.addf %84, %83 : vector<8x256xf32>
    %86 = arith.divf %84, %85 : vector<8x256xf32>
    %87 = vector.extract_strided_slice %86 {offsets = [0, 0], sizes = [8, 64], strides = [1, 1]} : vector<8x256xf32> to vector<8x64xf32>
    %88 = vector.extract_strided_slice %86 {offsets = [0, 64], sizes = [8, 64], strides = [1, 1]} : vector<8x256xf32> to vector<8x64xf32>
    %89 = vector.extract_strided_slice %86 {offsets = [0, 128], sizes = [8, 64], strides = [1, 1]} : vector<8x256xf32> to vector<8x64xf32>
    %cst_15 = arith.constant 2.000000e+00 : f32
    %90 = vector.broadcast %cst_15 : f32 to vector<8x64xf32>
    %91 = arith.mulf %90, %89 : vector<8x64xf32>
    %cst_16 = arith.constant 1.000000e+00 : f32
    %92 = vector.broadcast %cst_16 : f32 to vector<8x64xf32>
    %93 = arith.subf %91, %92 : vector<8x64xf32>
    %94 = vector.extract_strided_slice %86 {offsets = [0, 192], sizes = [8, 64], strides = [1, 1]} : vector<8x256xf32> to vector<8x64xf32>
    %95 = arith.mulf %88, %79 : vector<8x64xf32>
    %96 = arith.mulf %87, %93 : vector<8x64xf32>
    %97 = arith.addf %95, %96 : vector<8x64xf32>
    %98 = math.tanh %97 : vector<8x64xf32>
    %99 = arith.mulf %94, %98 : vector<8x64xf32>
    %cst_17 = arith.constant dense<0.000000e+00> : vector<8x256xf32>
    %100 = tpu.matmul %99, %33, %cst_17 {dimension_numbers = #tpu.dot_dimension_numbers<[1], [0], [0], [1], [0, 0, 1, 1], [], []>} : vector<8x64xf32>, vector<64x256xf32>, vector<8x256xf32> -> vector<8x256xf32>
    %101 = arith.addf %47, %100 : vector<8x256xf32>
    %102 = arith.negf %101 : vector<8x256xf32>
    %103 = math.exp %102 : vector<8x256xf32>
    %cst_18 = arith.constant 1.000000e+00 : f32
    %104 = vector.broadcast %cst_18 : f32 to vector<8x256xf32>
    %105 = arith.addf %104, %103 : vector<8x256xf32>
    %106 = arith.divf %104, %105 : vector<8x256xf32>
    %107 = vector.extract_strided_slice %106 {offsets = [0, 0], sizes = [8, 64], strides = [1, 1]} : vector<8x256xf32> to vector<8x64xf32>
    %108 = vector.extract_strided_slice %106 {offsets = [0, 64], sizes = [8, 64], strides = [1, 1]} : vector<8x256xf32> to vector<8x64xf32>
    %109 = vector.extract_strided_slice %106 {offsets = [0, 128], sizes = [8, 64], strides = [1, 1]} : vector<8x256xf32> to vector<8x64xf32>
    %cst_19 = arith.constant 2.000000e+00 : f32
    %110 = vector.broadcast %cst_19 : f32 to vector<8x64xf32>
    %111 = arith.mulf %110, %109 : vector<8x64xf32>
    %cst_20 = arith.constant 1.000000e+00 : f32
    %112 = vector.broadcast %cst_20 : f32 to vector<8x64xf32>
    %113 = arith.subf %111, %112 : vector<8x64xf32>
    %114 = vector.extract_strided_slice %106 {offsets = [0, 192], sizes = [8, 64], strides = [1, 1]} : vector<8x256xf32> to vector<8x64xf32>
    %115 = arith.mulf %108, %97 : vector<8x64xf32>
    %116 = arith.mulf %107, %113 : vector<8x64xf32>
    %117 = arith.addf %115, %116 : vector<8x64xf32>
    %118 = math.tanh %117 : vector<8x64xf32>
    %119 = arith.mulf %114, %118 : vector<8x64xf32>
    %cst_21 = arith.constant dense<0.000000e+00> : vector<8x256xf32>
    %120 = tpu.matmul %119, %33, %cst_21 {dimension_numbers = #tpu.dot_dimension_numbers<[1], [0], [0], [1], [0, 0, 1, 1], [], []>} : vector<8x64xf32>, vector<64x256xf32>, vector<8x256xf32> -> vector<8x256xf32>
    %121 = arith.addf %52, %120 : vector<8x256xf32>
    %122 = arith.negf %121 : vector<8x256xf32>
    %123 = math.exp %122 : vector<8x256xf32>
    %cst_22 = arith.constant 1.000000e+00 : f32
    %124 = vector.broadcast %cst_22 : f32 to vector<8x256xf32>
    %125 = arith.addf %124, %123 : vector<8x256xf32>
    %126 = arith.divf %124, %125 : vector<8x256xf32>
    %127 = vector.extract_strided_slice %126 {offsets = [0, 0], sizes = [8, 64], strides = [1, 1]} : vector<8x256xf32> to vector<8x64xf32>
    %128 = vector.extract_strided_slice %126 {offsets = [0, 64], sizes = [8, 64], strides = [1, 1]} : vector<8x256xf32> to vector<8x64xf32>
    %129 = vector.extract_strided_slice %126 {offsets = [0, 128], sizes = [8, 64], strides = [1, 1]} : vector<8x256xf32> to vector<8x64xf32>
    %cst_23 = arith.constant 2.000000e+00 : f32
    %130 = vector.broadcast %cst_23 : f32 to vector<8x64xf32>
    %131 = arith.mulf %130, %129 : vector<8x64xf32>
    %cst_24 = arith.constant 1.000000e+00 : f32
    %132 = vector.broadcast %cst_24 : f32 to vector<8x64xf32>
    %133 = arith.subf %131, %132 : vector<8x64xf32>
    %134 = vector.extract_strided_slice %126 {offsets = [0, 192], sizes = [8, 64], strides = [1, 1]} : vector<8x256xf32> to vector<8x64xf32>
    %135 = arith.mulf %128, %117 : vector<8x64xf32>
    %136 = arith.mulf %127, %133 : vector<8x64xf32>
    %137 = arith.addf %135, %136 : vector<8x64xf32>
    %138 = math.tanh %137 : vector<8x64xf32>
    %139 = arith.mulf %134, %138 : vector<8x64xf32>
    %cst_25 = arith.constant dense<0.000000e+00> : vector<8x256xf32>
    %140 = tpu.matmul %139, %33, %cst_25 {dimension_numbers = #tpu.dot_dimension_numbers<[1], [0], [0], [1], [0, 0, 1, 1], [], []>} : vector<8x64xf32>, vector<64x256xf32>, vector<8x256xf32> -> vector<8x256xf32>
    %141 = arith.addf %57, %140 : vector<8x256xf32>
    %142 = arith.negf %141 : vector<8x256xf32>
    %143 = math.exp %142 : vector<8x256xf32>
    %cst_26 = arith.constant 1.000000e+00 : f32
    %144 = vector.broadcast %cst_26 : f32 to vector<8x256xf32>
    %145 = arith.addf %144, %143 : vector<8x256xf32>
    %146 = arith.divf %144, %145 : vector<8x256xf32>
    %147 = vector.extract_strided_slice %146 {offsets = [0, 0], sizes = [8, 64], strides = [1, 1]} : vector<8x256xf32> to vector<8x64xf32>
    %148 = vector.extract_strided_slice %146 {offsets = [0, 64], sizes = [8, 64], strides = [1, 1]} : vector<8x256xf32> to vector<8x64xf32>
    %149 = vector.extract_strided_slice %146 {offsets = [0, 128], sizes = [8, 64], strides = [1, 1]} : vector<8x256xf32> to vector<8x64xf32>
    %cst_27 = arith.constant 2.000000e+00 : f32
    %150 = vector.broadcast %cst_27 : f32 to vector<8x64xf32>
    %151 = arith.mulf %150, %149 : vector<8x64xf32>
    %cst_28 = arith.constant 1.000000e+00 : f32
    %152 = vector.broadcast %cst_28 : f32 to vector<8x64xf32>
    %153 = arith.subf %151, %152 : vector<8x64xf32>
    %154 = vector.extract_strided_slice %146 {offsets = [0, 192], sizes = [8, 64], strides = [1, 1]} : vector<8x256xf32> to vector<8x64xf32>
    %155 = arith.mulf %148, %137 : vector<8x64xf32>
    %156 = arith.mulf %147, %153 : vector<8x64xf32>
    %157 = arith.addf %155, %156 : vector<8x64xf32>
    %158 = math.tanh %157 : vector<8x64xf32>
    %159 = arith.mulf %154, %158 : vector<8x64xf32>
    %cst_29 = arith.constant dense<0.000000e+00> : vector<8x256xf32>
    %160 = tpu.matmul %159, %33, %cst_29 {dimension_numbers = #tpu.dot_dimension_numbers<[1], [0], [0], [1], [0, 0, 1, 1], [], []>} : vector<8x64xf32>, vector<64x256xf32>, vector<8x256xf32> -> vector<8x256xf32>
    %161 = arith.addf %62, %160 : vector<8x256xf32>
    %162 = arith.negf %161 : vector<8x256xf32>
    %163 = math.exp %162 : vector<8x256xf32>
    %cst_30 = arith.constant 1.000000e+00 : f32
    %164 = vector.broadcast %cst_30 : f32 to vector<8x256xf32>
    %165 = arith.addf %164, %163 : vector<8x256xf32>
    %166 = arith.divf %164, %165 : vector<8x256xf32>
    %167 = vector.extract_strided_slice %166 {offsets = [0, 0], sizes = [8, 64], strides = [1, 1]} : vector<8x256xf32> to vector<8x64xf32>
    %168 = vector.extract_strided_slice %166 {offsets = [0, 64], sizes = [8, 64], strides = [1, 1]} : vector<8x256xf32> to vector<8x64xf32>
    %169 = vector.extract_strided_slice %166 {offsets = [0, 128], sizes = [8, 64], strides = [1, 1]} : vector<8x256xf32> to vector<8x64xf32>
    %cst_31 = arith.constant 2.000000e+00 : f32
    %170 = vector.broadcast %cst_31 : f32 to vector<8x64xf32>
    %171 = arith.mulf %170, %169 : vector<8x64xf32>
    %cst_32 = arith.constant 1.000000e+00 : f32
    %172 = vector.broadcast %cst_32 : f32 to vector<8x64xf32>
    %173 = arith.subf %171, %172 : vector<8x64xf32>
    %174 = vector.extract_strided_slice %166 {offsets = [0, 192], sizes = [8, 64], strides = [1, 1]} : vector<8x256xf32> to vector<8x64xf32>
    %175 = arith.mulf %168, %157 : vector<8x64xf32>
    %176 = arith.mulf %167, %173 : vector<8x64xf32>
    %177 = arith.addf %175, %176 : vector<8x64xf32>
    %178 = math.tanh %177 : vector<8x64xf32>
    %179 = arith.mulf %174, %178 : vector<8x64xf32>
    %cst_33 = arith.constant dense<0.000000e+00> : vector<8x256xf32>
    %180 = tpu.matmul %179, %33, %cst_33 {dimension_numbers = #tpu.dot_dimension_numbers<[1], [0], [0], [1], [0, 0, 1, 1], [], []>} : vector<8x64xf32>, vector<64x256xf32>, vector<8x256xf32> -> vector<8x256xf32>
    %181 = arith.addf %67, %180 : vector<8x256xf32>
    %182 = arith.negf %181 : vector<8x256xf32>
    %183 = math.exp %182 : vector<8x256xf32>
    %cst_34 = arith.constant 1.000000e+00 : f32
    %184 = vector.broadcast %cst_34 : f32 to vector<8x256xf32>
    %185 = arith.addf %184, %183 : vector<8x256xf32>
    %186 = arith.divf %184, %185 : vector<8x256xf32>
    %187 = vector.extract_strided_slice %186 {offsets = [0, 0], sizes = [8, 64], strides = [1, 1]} : vector<8x256xf32> to vector<8x64xf32>
    %188 = vector.extract_strided_slice %186 {offsets = [0, 64], sizes = [8, 64], strides = [1, 1]} : vector<8x256xf32> to vector<8x64xf32>
    %189 = vector.extract_strided_slice %186 {offsets = [0, 128], sizes = [8, 64], strides = [1, 1]} : vector<8x256xf32> to vector<8x64xf32>
    %cst_35 = arith.constant 2.000000e+00 : f32
    %190 = vector.broadcast %cst_35 : f32 to vector<8x64xf32>
    %191 = arith.mulf %190, %189 : vector<8x64xf32>
    %cst_36 = arith.constant 1.000000e+00 : f32
    %192 = vector.broadcast %cst_36 : f32 to vector<8x64xf32>
    %193 = arith.subf %191, %192 : vector<8x64xf32>
    %194 = vector.extract_strided_slice %186 {offsets = [0, 192], sizes = [8, 64], strides = [1, 1]} : vector<8x256xf32> to vector<8x64xf32>
    %195 = arith.mulf %188, %177 : vector<8x64xf32>
    %196 = arith.mulf %187, %193 : vector<8x64xf32>
    %197 = arith.addf %195, %196 : vector<8x64xf32>
    %198 = math.tanh %197 : vector<8x64xf32>
    %199 = arith.mulf %194, %198 : vector<8x64xf32>
    %cst_37 = arith.constant dense<0.000000e+00> : vector<8x256xf32>
    %200 = tpu.matmul %199, %33, %cst_37 {dimension_numbers = #tpu.dot_dimension_numbers<[1], [0], [0], [1], [0, 0, 1, 1], [], []>} : vector<8x64xf32>, vector<64x256xf32>, vector<8x256xf32> -> vector<8x256xf32>
    %201 = arith.addf %72, %200 : vector<8x256xf32>
    %202 = arith.negf %201 : vector<8x256xf32>
    %203 = math.exp %202 : vector<8x256xf32>
    %cst_38 = arith.constant 1.000000e+00 : f32
    %204 = vector.broadcast %cst_38 : f32 to vector<8x256xf32>
    %205 = arith.addf %204, %203 : vector<8x256xf32>
    %206 = arith.divf %204, %205 : vector<8x256xf32>
    %207 = vector.extract_strided_slice %206 {offsets = [0, 0], sizes = [8, 64], strides = [1, 1]} : vector<8x256xf32> to vector<8x64xf32>
    %208 = vector.extract_strided_slice %206 {offsets = [0, 64], sizes = [8, 64], strides = [1, 1]} : vector<8x256xf32> to vector<8x64xf32>
    %209 = vector.extract_strided_slice %206 {offsets = [0, 128], sizes = [8, 64], strides = [1, 1]} : vector<8x256xf32> to vector<8x64xf32>
    %cst_39 = arith.constant 2.000000e+00 : f32
    %210 = vector.broadcast %cst_39 : f32 to vector<8x64xf32>
    %211 = arith.mulf %210, %209 : vector<8x64xf32>
    %cst_40 = arith.constant 1.000000e+00 : f32
    %212 = vector.broadcast %cst_40 : f32 to vector<8x64xf32>
    %213 = arith.subf %211, %212 : vector<8x64xf32>
    %214 = vector.extract_strided_slice %206 {offsets = [0, 192], sizes = [8, 64], strides = [1, 1]} : vector<8x256xf32> to vector<8x64xf32>
    %215 = arith.mulf %208, %197 : vector<8x64xf32>
    %216 = arith.mulf %207, %213 : vector<8x64xf32>
    %217 = arith.addf %215, %216 : vector<8x64xf32>
    %218 = math.tanh %217 : vector<8x64xf32>
    %219 = arith.mulf %214, %218 : vector<8x64xf32>
    %cst_41 = arith.constant dense<0.000000e+00> : vector<8x256xf32>
    %220 = tpu.matmul %219, %33, %cst_41 {dimension_numbers = #tpu.dot_dimension_numbers<[1], [0], [0], [1], [0, 0, 1, 1], [], []>} : vector<8x64xf32>, vector<64x256xf32>, vector<8x256xf32> -> vector<8x256xf32>
    %221 = arith.addf %77, %220 : vector<8x256xf32>
    %222 = arith.negf %221 : vector<8x256xf32>
    %223 = math.exp %222 : vector<8x256xf32>
    %cst_42 = arith.constant 1.000000e+00 : f32
    %224 = vector.broadcast %cst_42 : f32 to vector<8x256xf32>
    %225 = arith.addf %224, %223 : vector<8x256xf32>
    %226 = arith.divf %224, %225 : vector<8x256xf32>
    %227 = vector.extract_strided_slice %226 {offsets = [0, 0], sizes = [8, 64], strides = [1, 1]} : vector<8x256xf32> to vector<8x64xf32>
    %228 = vector.extract_strided_slice %226 {offsets = [0, 64], sizes = [8, 64], strides = [1, 1]} : vector<8x256xf32> to vector<8x64xf32>
    %229 = vector.extract_strided_slice %226 {offsets = [0, 128], sizes = [8, 64], strides = [1, 1]} : vector<8x256xf32> to vector<8x64xf32>
    %cst_43 = arith.constant 2.000000e+00 : f32
    %230 = vector.broadcast %cst_43 : f32 to vector<8x64xf32>
    %231 = arith.mulf %230, %229 : vector<8x64xf32>
    %cst_44 = arith.constant 1.000000e+00 : f32
    %232 = vector.broadcast %cst_44 : f32 to vector<8x64xf32>
    %233 = arith.subf %231, %232 : vector<8x64xf32>
    %234 = vector.extract_strided_slice %226 {offsets = [0, 192], sizes = [8, 64], strides = [1, 1]} : vector<8x256xf32> to vector<8x64xf32>
    %235 = arith.mulf %228, %217 : vector<8x64xf32>
    %236 = arith.mulf %227, %233 : vector<8x64xf32>
    %237 = arith.addf %235, %236 : vector<8x64xf32>
    %238 = math.tanh %237 : vector<8x64xf32>
    %239 = arith.mulf %234, %238 : vector<8x64xf32>
    %240 = vector.shape_cast %21 : vector<1x64xi1> to vector<1x64xi1>
    %241 = vector.broadcast %240 : vector<1x64xi1> to vector<8x64xi1>
    %242 = arith.select %241, %99, %239 : vector<8x64xi1>, vector<8x64xf32>
    %243 = vector.shape_cast %21 : vector<1x64xi1> to vector<1x64xi1>
    %244 = vector.broadcast %243 : vector<1x64xi1> to vector<8x64xi1>
    %245 = arith.select %244, %119, %219 : vector<8x64xi1>, vector<8x64xf32>
    %246 = vector.shape_cast %21 : vector<1x64xi1> to vector<1x64xi1>
    %247 = vector.broadcast %246 : vector<1x64xi1> to vector<8x64xi1>
    %248 = arith.select %247, %139, %199 : vector<8x64xi1>, vector<8x64xf32>
    %249 = vector.shape_cast %21 : vector<1x64xi1> to vector<1x64xi1>
    %250 = vector.broadcast %249 : vector<1x64xi1> to vector<8x64xi1>
    %251 = arith.select %250, %159, %179 : vector<8x64xi1>, vector<8x64xf32>
    %252 = vector.shape_cast %21 : vector<1x64xi1> to vector<1x64xi1>
    %253 = vector.broadcast %252 : vector<1x64xi1> to vector<8x64xi1>
    %254 = arith.select %253, %179, %159 : vector<8x64xi1>, vector<8x64xf32>
    %255 = vector.shape_cast %21 : vector<1x64xi1> to vector<1x64xi1>
    %256 = vector.broadcast %255 : vector<1x64xi1> to vector<8x64xi1>
    %257 = arith.select %256, %199, %139 : vector<8x64xi1>, vector<8x64xf32>
    %258 = vector.shape_cast %21 : vector<1x64xi1> to vector<1x64xi1>
    %259 = vector.broadcast %258 : vector<1x64xi1> to vector<8x64xi1>
    %260 = arith.select %259, %219, %119 : vector<8x64xi1>, vector<8x64xf32>
    %261 = vector.shape_cast %21 : vector<1x64xi1> to vector<1x64xi1>
    %262 = vector.broadcast %261 : vector<1x64xi1> to vector<8x64xi1>
    %263 = arith.select %262, %239, %99 : vector<8x64xi1>, vector<8x64xf32>
    %264 = tpu.concatenate %242, %245, %248, %251, %254, %257, %260, %263 in 0 : vector<8x64xf32>, vector<8x64xf32>, vector<8x64xf32>, vector<8x64xf32>, vector<8x64xf32>, vector<8x64xf32>, vector<8x64xf32>, vector<8x64xf32> -> vector<64x64xf32>
    %c0_45 = arith.constant 0 : index
    %c0_46 = arith.constant 0 : index
    %265 = vector.load %arg5[%c0_45, %c0_46] : memref<64x256xf32, #tpu.memory_space<vmem>>, vector<64x256xf32>
    %c0_47 = arith.constant 0 : index
    %c0_48 = arith.constant 0 : index
    %266 = vector.load %arg6[%c0_47, %c0_48] : memref<64x256xf32, #tpu.memory_space<vmem>>, vector<64x256xf32>
    %c0_49 = arith.constant 0 : index
    %c0_50 = arith.constant 0 : index
    %267 = vector.load %arg7[%c0_49, %c0_50] : memref<1x256xf32, #tpu.memory_space<vmem>>, vector<1x256xf32>
    %cst_51 = arith.constant dense<0.000000e+00> : vector<64x256xf32>
    %268 = tpu.matmul %264, %265, %cst_51 {dimension_numbers = #tpu.dot_dimension_numbers<[1], [0], [0], [1], [0, 0, 1, 1], [], []>} : vector<64x64xf32>, vector<64x256xf32>, vector<64x256xf32> -> vector<64x256xf32>
    %269 = vector.broadcast %267 : vector<1x256xf32> to vector<64x256xf32>
    %270 = arith.addf %268, %269 : vector<64x256xf32>
    %271 = vector.extract_strided_slice %270 {offsets = [0, 0], sizes = [8, 256], strides = [1, 1]} : vector<64x256xf32> to vector<8x256xf32>
    %272 = vector.extract_strided_slice %270 {offsets = [56, 0], sizes = [8, 256], strides = [1, 1]} : vector<64x256xf32> to vector<8x256xf32>
    %273 = vector.shape_cast %18 : vector<1x256xi1> to vector<1x256xi1>
    %274 = vector.broadcast %273 : vector<1x256xi1> to vector<8x256xi1>
    %275 = arith.select %274, %271, %272 : vector<8x256xi1>, vector<8x256xf32>
    %276 = vector.extract_strided_slice %270 {offsets = [8, 0], sizes = [8, 256], strides = [1, 1]} : vector<64x256xf32> to vector<8x256xf32>
    %277 = vector.extract_strided_slice %270 {offsets = [48, 0], sizes = [8, 256], strides = [1, 1]} : vector<64x256xf32> to vector<8x256xf32>
    %278 = vector.shape_cast %18 : vector<1x256xi1> to vector<1x256xi1>
    %279 = vector.broadcast %278 : vector<1x256xi1> to vector<8x256xi1>
    %280 = arith.select %279, %276, %277 : vector<8x256xi1>, vector<8x256xf32>
    %281 = vector.extract_strided_slice %270 {offsets = [16, 0], sizes = [8, 256], strides = [1, 1]} : vector<64x256xf32> to vector<8x256xf32>
    %282 = vector.extract_strided_slice %270 {offsets = [40, 0], sizes = [8, 256], strides = [1, 1]} : vector<64x256xf32> to vector<8x256xf32>
    %283 = vector.shape_cast %18 : vector<1x256xi1> to vector<1x256xi1>
    %284 = vector.broadcast %283 : vector<1x256xi1> to vector<8x256xi1>
    %285 = arith.select %284, %281, %282 : vector<8x256xi1>, vector<8x256xf32>
    %286 = vector.extract_strided_slice %270 {offsets = [24, 0], sizes = [8, 256], strides = [1, 1]} : vector<64x256xf32> to vector<8x256xf32>
    %287 = vector.extract_strided_slice %270 {offsets = [32, 0], sizes = [8, 256], strides = [1, 1]} : vector<64x256xf32> to vector<8x256xf32>
    %288 = vector.shape_cast %18 : vector<1x256xi1> to vector<1x256xi1>
    %289 = vector.broadcast %288 : vector<1x256xi1> to vector<8x256xi1>
    %290 = arith.select %289, %286, %287 : vector<8x256xi1>, vector<8x256xf32>
    %291 = vector.extract_strided_slice %270 {offsets = [32, 0], sizes = [8, 256], strides = [1, 1]} : vector<64x256xf32> to vector<8x256xf32>
    %292 = vector.extract_strided_slice %270 {offsets = [24, 0], sizes = [8, 256], strides = [1, 1]} : vector<64x256xf32> to vector<8x256xf32>
    %293 = vector.shape_cast %18 : vector<1x256xi1> to vector<1x256xi1>
    %294 = vector.broadcast %293 : vector<1x256xi1> to vector<8x256xi1>
    %295 = arith.select %294, %291, %292 : vector<8x256xi1>, vector<8x256xf32>
    %296 = vector.extract_strided_slice %270 {offsets = [40, 0], sizes = [8, 256], strides = [1, 1]} : vector<64x256xf32> to vector<8x256xf32>
    %297 = vector.extract_strided_slice %270 {offsets = [16, 0], sizes = [8, 256], strides = [1, 1]} : vector<64x256xf32> to vector<8x256xf32>
    %298 = vector.shape_cast %18 : vector<1x256xi1> to vector<1x256xi1>
    %299 = vector.broadcast %298 : vector<1x256xi1> to vector<8x256xi1>
    %300 = arith.select %299, %296, %297 : vector<8x256xi1>, vector<8x256xf32>
    %301 = vector.extract_strided_slice %270 {offsets = [48, 0], sizes = [8, 256], strides = [1, 1]} : vector<64x256xf32> to vector<8x256xf32>
    %302 = vector.extract_strided_slice %270 {offsets = [8, 0], sizes = [8, 256], strides = [1, 1]} : vector<64x256xf32> to vector<8x256xf32>
    %303 = vector.shape_cast %18 : vector<1x256xi1> to vector<1x256xi1>
    %304 = vector.broadcast %303 : vector<1x256xi1> to vector<8x256xi1>
    %305 = arith.select %304, %301, %302 : vector<8x256xi1>, vector<8x256xf32>
    %306 = vector.extract_strided_slice %270 {offsets = [56, 0], sizes = [8, 256], strides = [1, 1]} : vector<64x256xf32> to vector<8x256xf32>
    %307 = vector.extract_strided_slice %270 {offsets = [0, 0], sizes = [8, 256], strides = [1, 1]} : vector<64x256xf32> to vector<8x256xf32>
    %308 = vector.shape_cast %18 : vector<1x256xi1> to vector<1x256xi1>
    %309 = vector.broadcast %308 : vector<1x256xi1> to vector<8x256xi1>
    %310 = arith.select %309, %306, %307 : vector<8x256xi1>, vector<8x256xf32>
    %cst_52 = arith.constant 0.000000e+00 : f32
    %311 = vector.broadcast %cst_52 : f32 to vector<8x64xf32>
    %cst_53 = arith.constant 0.000000e+00 : f32
    %312 = vector.broadcast %cst_53 : f32 to vector<8x64xf32>
    %cst_54 = arith.constant dense<0.000000e+00> : vector<8x256xf32>
    %313 = tpu.matmul %311, %266, %cst_54 {dimension_numbers = #tpu.dot_dimension_numbers<[1], [0], [0], [1], [0, 0, 1, 1], [], []>} : vector<8x64xf32>, vector<64x256xf32>, vector<8x256xf32> -> vector<8x256xf32>
    %314 = arith.addf %275, %313 : vector<8x256xf32>
    %315 = arith.negf %314 : vector<8x256xf32>
    %316 = math.exp %315 : vector<8x256xf32>
    %cst_55 = arith.constant 1.000000e+00 : f32
    %317 = vector.broadcast %cst_55 : f32 to vector<8x256xf32>
    %318 = arith.addf %317, %316 : vector<8x256xf32>
    %319 = arith.divf %317, %318 : vector<8x256xf32>
    %320 = vector.extract_strided_slice %319 {offsets = [0, 0], sizes = [8, 64], strides = [1, 1]} : vector<8x256xf32> to vector<8x64xf32>
    %321 = vector.extract_strided_slice %319 {offsets = [0, 64], sizes = [8, 64], strides = [1, 1]} : vector<8x256xf32> to vector<8x64xf32>
    %322 = vector.extract_strided_slice %319 {offsets = [0, 128], sizes = [8, 64], strides = [1, 1]} : vector<8x256xf32> to vector<8x64xf32>
    %cst_56 = arith.constant 2.000000e+00 : f32
    %323 = vector.broadcast %cst_56 : f32 to vector<8x64xf32>
    %324 = arith.mulf %323, %322 : vector<8x64xf32>
    %cst_57 = arith.constant 1.000000e+00 : f32
    %325 = vector.broadcast %cst_57 : f32 to vector<8x64xf32>
    %326 = arith.subf %324, %325 : vector<8x64xf32>
    %327 = vector.extract_strided_slice %319 {offsets = [0, 192], sizes = [8, 64], strides = [1, 1]} : vector<8x256xf32> to vector<8x64xf32>
    %328 = arith.mulf %321, %312 : vector<8x64xf32>
    %329 = arith.mulf %320, %326 : vector<8x64xf32>
    %330 = arith.addf %328, %329 : vector<8x64xf32>
    %331 = math.tanh %330 : vector<8x64xf32>
    %332 = arith.mulf %327, %331 : vector<8x64xf32>
    %cst_58 = arith.constant dense<0.000000e+00> : vector<8x256xf32>
    %333 = tpu.matmul %332, %266, %cst_58 {dimension_numbers = #tpu.dot_dimension_numbers<[1], [0], [0], [1], [0, 0, 1, 1], [], []>} : vector<8x64xf32>, vector<64x256xf32>, vector<8x256xf32> -> vector<8x256xf32>
    %334 = arith.addf %280, %333 : vector<8x256xf32>
    %335 = arith.negf %334 : vector<8x256xf32>
    %336 = math.exp %335 : vector<8x256xf32>
    %cst_59 = arith.constant 1.000000e+00 : f32
    %337 = vector.broadcast %cst_59 : f32 to vector<8x256xf32>
    %338 = arith.addf %337, %336 : vector<8x256xf32>
    %339 = arith.divf %337, %338 : vector<8x256xf32>
    %340 = vector.extract_strided_slice %339 {offsets = [0, 0], sizes = [8, 64], strides = [1, 1]} : vector<8x256xf32> to vector<8x64xf32>
    %341 = vector.extract_strided_slice %339 {offsets = [0, 64], sizes = [8, 64], strides = [1, 1]} : vector<8x256xf32> to vector<8x64xf32>
    %342 = vector.extract_strided_slice %339 {offsets = [0, 128], sizes = [8, 64], strides = [1, 1]} : vector<8x256xf32> to vector<8x64xf32>
    %cst_60 = arith.constant 2.000000e+00 : f32
    %343 = vector.broadcast %cst_60 : f32 to vector<8x64xf32>
    %344 = arith.mulf %343, %342 : vector<8x64xf32>
    %cst_61 = arith.constant 1.000000e+00 : f32
    %345 = vector.broadcast %cst_61 : f32 to vector<8x64xf32>
    %346 = arith.subf %344, %345 : vector<8x64xf32>
    %347 = vector.extract_strided_slice %339 {offsets = [0, 192], sizes = [8, 64], strides = [1, 1]} : vector<8x256xf32> to vector<8x64xf32>
    %348 = arith.mulf %341, %330 : vector<8x64xf32>
    %349 = arith.mulf %340, %346 : vector<8x64xf32>
    %350 = arith.addf %348, %349 : vector<8x64xf32>
    %351 = math.tanh %350 : vector<8x64xf32>
    %352 = arith.mulf %347, %351 : vector<8x64xf32>
    %cst_62 = arith.constant dense<0.000000e+00> : vector<8x256xf32>
    %353 = tpu.matmul %352, %266, %cst_62 {dimension_numbers = #tpu.dot_dimension_numbers<[1], [0], [0], [1], [0, 0, 1, 1], [], []>} : vector<8x64xf32>, vector<64x256xf32>, vector<8x256xf32> -> vector<8x256xf32>
    %354 = arith.addf %285, %353 : vector<8x256xf32>
    %355 = arith.negf %354 : vector<8x256xf32>
    %356 = math.exp %355 : vector<8x256xf32>
    %cst_63 = arith.constant 1.000000e+00 : f32
    %357 = vector.broadcast %cst_63 : f32 to vector<8x256xf32>
    %358 = arith.addf %357, %356 : vector<8x256xf32>
    %359 = arith.divf %357, %358 : vector<8x256xf32>
    %360 = vector.extract_strided_slice %359 {offsets = [0, 0], sizes = [8, 64], strides = [1, 1]} : vector<8x256xf32> to vector<8x64xf32>
    %361 = vector.extract_strided_slice %359 {offsets = [0, 64], sizes = [8, 64], strides = [1, 1]} : vector<8x256xf32> to vector<8x64xf32>
    %362 = vector.extract_strided_slice %359 {offsets = [0, 128], sizes = [8, 64], strides = [1, 1]} : vector<8x256xf32> to vector<8x64xf32>
    %cst_64 = arith.constant 2.000000e+00 : f32
    %363 = vector.broadcast %cst_64 : f32 to vector<8x64xf32>
    %364 = arith.mulf %363, %362 : vector<8x64xf32>
    %cst_65 = arith.constant 1.000000e+00 : f32
    %365 = vector.broadcast %cst_65 : f32 to vector<8x64xf32>
    %366 = arith.subf %364, %365 : vector<8x64xf32>
    %367 = vector.extract_strided_slice %359 {offsets = [0, 192], sizes = [8, 64], strides = [1, 1]} : vector<8x256xf32> to vector<8x64xf32>
    %368 = arith.mulf %361, %350 : vector<8x64xf32>
    %369 = arith.mulf %360, %366 : vector<8x64xf32>
    %370 = arith.addf %368, %369 : vector<8x64xf32>
    %371 = math.tanh %370 : vector<8x64xf32>
    %372 = arith.mulf %367, %371 : vector<8x64xf32>
    %cst_66 = arith.constant dense<0.000000e+00> : vector<8x256xf32>
    %373 = tpu.matmul %372, %266, %cst_66 {dimension_numbers = #tpu.dot_dimension_numbers<[1], [0], [0], [1], [0, 0, 1, 1], [], []>} : vector<8x64xf32>, vector<64x256xf32>, vector<8x256xf32> -> vector<8x256xf32>
    %374 = arith.addf %290, %373 : vector<8x256xf32>
    %375 = arith.negf %374 : vector<8x256xf32>
    %376 = math.exp %375 : vector<8x256xf32>
    %cst_67 = arith.constant 1.000000e+00 : f32
    %377 = vector.broadcast %cst_67 : f32 to vector<8x256xf32>
    %378 = arith.addf %377, %376 : vector<8x256xf32>
    %379 = arith.divf %377, %378 : vector<8x256xf32>
    %380 = vector.extract_strided_slice %379 {offsets = [0, 0], sizes = [8, 64], strides = [1, 1]} : vector<8x256xf32> to vector<8x64xf32>
    %381 = vector.extract_strided_slice %379 {offsets = [0, 64], sizes = [8, 64], strides = [1, 1]} : vector<8x256xf32> to vector<8x64xf32>
    %382 = vector.extract_strided_slice %379 {offsets = [0, 128], sizes = [8, 64], strides = [1, 1]} : vector<8x256xf32> to vector<8x64xf32>
    %cst_68 = arith.constant 2.000000e+00 : f32
    %383 = vector.broadcast %cst_68 : f32 to vector<8x64xf32>
    %384 = arith.mulf %383, %382 : vector<8x64xf32>
    %cst_69 = arith.constant 1.000000e+00 : f32
    %385 = vector.broadcast %cst_69 : f32 to vector<8x64xf32>
    %386 = arith.subf %384, %385 : vector<8x64xf32>
    %387 = vector.extract_strided_slice %379 {offsets = [0, 192], sizes = [8, 64], strides = [1, 1]} : vector<8x256xf32> to vector<8x64xf32>
    %388 = arith.mulf %381, %370 : vector<8x64xf32>
    %389 = arith.mulf %380, %386 : vector<8x64xf32>
    %390 = arith.addf %388, %389 : vector<8x64xf32>
    %391 = math.tanh %390 : vector<8x64xf32>
    %392 = arith.mulf %387, %391 : vector<8x64xf32>
    %cst_70 = arith.constant dense<0.000000e+00> : vector<8x256xf32>
    %393 = tpu.matmul %392, %266, %cst_70 {dimension_numbers = #tpu.dot_dimension_numbers<[1], [0], [0], [1], [0, 0, 1, 1], [], []>} : vector<8x64xf32>, vector<64x256xf32>, vector<8x256xf32> -> vector<8x256xf32>
    %394 = arith.addf %295, %393 : vector<8x256xf32>
    %395 = arith.negf %394 : vector<8x256xf32>
    %396 = math.exp %395 : vector<8x256xf32>
    %cst_71 = arith.constant 1.000000e+00 : f32
    %397 = vector.broadcast %cst_71 : f32 to vector<8x256xf32>
    %398 = arith.addf %397, %396 : vector<8x256xf32>
    %399 = arith.divf %397, %398 : vector<8x256xf32>
    %400 = vector.extract_strided_slice %399 {offsets = [0, 0], sizes = [8, 64], strides = [1, 1]} : vector<8x256xf32> to vector<8x64xf32>
    %401 = vector.extract_strided_slice %399 {offsets = [0, 64], sizes = [8, 64], strides = [1, 1]} : vector<8x256xf32> to vector<8x64xf32>
    %402 = vector.extract_strided_slice %399 {offsets = [0, 128], sizes = [8, 64], strides = [1, 1]} : vector<8x256xf32> to vector<8x64xf32>
    %cst_72 = arith.constant 2.000000e+00 : f32
    %403 = vector.broadcast %cst_72 : f32 to vector<8x64xf32>
    %404 = arith.mulf %403, %402 : vector<8x64xf32>
    %cst_73 = arith.constant 1.000000e+00 : f32
    %405 = vector.broadcast %cst_73 : f32 to vector<8x64xf32>
    %406 = arith.subf %404, %405 : vector<8x64xf32>
    %407 = vector.extract_strided_slice %399 {offsets = [0, 192], sizes = [8, 64], strides = [1, 1]} : vector<8x256xf32> to vector<8x64xf32>
    %408 = arith.mulf %401, %390 : vector<8x64xf32>
    %409 = arith.mulf %400, %406 : vector<8x64xf32>
    %410 = arith.addf %408, %409 : vector<8x64xf32>
    %411 = math.tanh %410 : vector<8x64xf32>
    %412 = arith.mulf %407, %411 : vector<8x64xf32>
    %cst_74 = arith.constant dense<0.000000e+00> : vector<8x256xf32>
    %413 = tpu.matmul %412, %266, %cst_74 {dimension_numbers = #tpu.dot_dimension_numbers<[1], [0], [0], [1], [0, 0, 1, 1], [], []>} : vector<8x64xf32>, vector<64x256xf32>, vector<8x256xf32> -> vector<8x256xf32>
    %414 = arith.addf %300, %413 : vector<8x256xf32>
    %415 = arith.negf %414 : vector<8x256xf32>
    %416 = math.exp %415 : vector<8x256xf32>
    %cst_75 = arith.constant 1.000000e+00 : f32
    %417 = vector.broadcast %cst_75 : f32 to vector<8x256xf32>
    %418 = arith.addf %417, %416 : vector<8x256xf32>
    %419 = arith.divf %417, %418 : vector<8x256xf32>
    %420 = vector.extract_strided_slice %419 {offsets = [0, 0], sizes = [8, 64], strides = [1, 1]} : vector<8x256xf32> to vector<8x64xf32>
    %421 = vector.extract_strided_slice %419 {offsets = [0, 64], sizes = [8, 64], strides = [1, 1]} : vector<8x256xf32> to vector<8x64xf32>
    %422 = vector.extract_strided_slice %419 {offsets = [0, 128], sizes = [8, 64], strides = [1, 1]} : vector<8x256xf32> to vector<8x64xf32>
    %cst_76 = arith.constant 2.000000e+00 : f32
    %423 = vector.broadcast %cst_76 : f32 to vector<8x64xf32>
    %424 = arith.mulf %423, %422 : vector<8x64xf32>
    %cst_77 = arith.constant 1.000000e+00 : f32
    %425 = vector.broadcast %cst_77 : f32 to vector<8x64xf32>
    %426 = arith.subf %424, %425 : vector<8x64xf32>
    %427 = vector.extract_strided_slice %419 {offsets = [0, 192], sizes = [8, 64], strides = [1, 1]} : vector<8x256xf32> to vector<8x64xf32>
    %428 = arith.mulf %421, %410 : vector<8x64xf32>
    %429 = arith.mulf %420, %426 : vector<8x64xf32>
    %430 = arith.addf %428, %429 : vector<8x64xf32>
    %431 = math.tanh %430 : vector<8x64xf32>
    %432 = arith.mulf %427, %431 : vector<8x64xf32>
    %cst_78 = arith.constant dense<0.000000e+00> : vector<8x256xf32>
    %433 = tpu.matmul %432, %266, %cst_78 {dimension_numbers = #tpu.dot_dimension_numbers<[1], [0], [0], [1], [0, 0, 1, 1], [], []>} : vector<8x64xf32>, vector<64x256xf32>, vector<8x256xf32> -> vector<8x256xf32>
    %434 = arith.addf %305, %433 : vector<8x256xf32>
    %435 = arith.negf %434 : vector<8x256xf32>
    %436 = math.exp %435 : vector<8x256xf32>
    %cst_79 = arith.constant 1.000000e+00 : f32
    %437 = vector.broadcast %cst_79 : f32 to vector<8x256xf32>
    %438 = arith.addf %437, %436 : vector<8x256xf32>
    %439 = arith.divf %437, %438 : vector<8x256xf32>
    %440 = vector.extract_strided_slice %439 {offsets = [0, 0], sizes = [8, 64], strides = [1, 1]} : vector<8x256xf32> to vector<8x64xf32>
    %441 = vector.extract_strided_slice %439 {offsets = [0, 64], sizes = [8, 64], strides = [1, 1]} : vector<8x256xf32> to vector<8x64xf32>
    %442 = vector.extract_strided_slice %439 {offsets = [0, 128], sizes = [8, 64], strides = [1, 1]} : vector<8x256xf32> to vector<8x64xf32>
    %cst_80 = arith.constant 2.000000e+00 : f32
    %443 = vector.broadcast %cst_80 : f32 to vector<8x64xf32>
    %444 = arith.mulf %443, %442 : vector<8x64xf32>
    %cst_81 = arith.constant 1.000000e+00 : f32
    %445 = vector.broadcast %cst_81 : f32 to vector<8x64xf32>
    %446 = arith.subf %444, %445 : vector<8x64xf32>
    %447 = vector.extract_strided_slice %439 {offsets = [0, 192], sizes = [8, 64], strides = [1, 1]} : vector<8x256xf32> to vector<8x64xf32>
    %448 = arith.mulf %441, %430 : vector<8x64xf32>
    %449 = arith.mulf %440, %446 : vector<8x64xf32>
    %450 = arith.addf %448, %449 : vector<8x64xf32>
    %451 = math.tanh %450 : vector<8x64xf32>
    %452 = arith.mulf %447, %451 : vector<8x64xf32>
    %cst_82 = arith.constant dense<0.000000e+00> : vector<8x256xf32>
    %453 = tpu.matmul %452, %266, %cst_82 {dimension_numbers = #tpu.dot_dimension_numbers<[1], [0], [0], [1], [0, 0, 1, 1], [], []>} : vector<8x64xf32>, vector<64x256xf32>, vector<8x256xf32> -> vector<8x256xf32>
    %454 = arith.addf %310, %453 : vector<8x256xf32>
    %455 = arith.negf %454 : vector<8x256xf32>
    %456 = math.exp %455 : vector<8x256xf32>
    %cst_83 = arith.constant 1.000000e+00 : f32
    %457 = vector.broadcast %cst_83 : f32 to vector<8x256xf32>
    %458 = arith.addf %457, %456 : vector<8x256xf32>
    %459 = arith.divf %457, %458 : vector<8x256xf32>
    %460 = vector.extract_strided_slice %459 {offsets = [0, 0], sizes = [8, 64], strides = [1, 1]} : vector<8x256xf32> to vector<8x64xf32>
    %461 = vector.extract_strided_slice %459 {offsets = [0, 64], sizes = [8, 64], strides = [1, 1]} : vector<8x256xf32> to vector<8x64xf32>
    %462 = vector.extract_strided_slice %459 {offsets = [0, 128], sizes = [8, 64], strides = [1, 1]} : vector<8x256xf32> to vector<8x64xf32>
    %cst_84 = arith.constant 2.000000e+00 : f32
    %463 = vector.broadcast %cst_84 : f32 to vector<8x64xf32>
    %464 = arith.mulf %463, %462 : vector<8x64xf32>
    %cst_85 = arith.constant 1.000000e+00 : f32
    %465 = vector.broadcast %cst_85 : f32 to vector<8x64xf32>
    %466 = arith.subf %464, %465 : vector<8x64xf32>
    %467 = vector.extract_strided_slice %459 {offsets = [0, 192], sizes = [8, 64], strides = [1, 1]} : vector<8x256xf32> to vector<8x64xf32>
    %468 = arith.mulf %461, %450 : vector<8x64xf32>
    %469 = arith.mulf %460, %466 : vector<8x64xf32>
    %470 = arith.addf %468, %469 : vector<8x64xf32>
    %471 = math.tanh %470 : vector<8x64xf32>
    %472 = arith.mulf %467, %471 : vector<8x64xf32>
    %473 = vector.extract_strided_slice %332 {offsets = [0, 0], sizes = [8, 32], strides = [1, 1]} : vector<8x64xf32> to vector<8x32xf32>
    %474 = vector.extract_strided_slice %332 {offsets = [0, 32], sizes = [8, 32], strides = [1, 1]} : vector<8x64xf32> to vector<8x32xf32>
    %475 = arith.addf %473, %474 : vector<8x32xf32>
    %cst_86 = arith.constant 5.000000e-01 : f32
    %476 = vector.broadcast %cst_86 : f32 to vector<8x32xf32>
    %477 = arith.mulf %475, %476 : vector<8x32xf32>
    %478 = vector.extract_strided_slice %352 {offsets = [0, 0], sizes = [8, 32], strides = [1, 1]} : vector<8x64xf32> to vector<8x32xf32>
    %479 = vector.extract_strided_slice %352 {offsets = [0, 32], sizes = [8, 32], strides = [1, 1]} : vector<8x64xf32> to vector<8x32xf32>
    %480 = arith.addf %478, %479 : vector<8x32xf32>
    %cst_87 = arith.constant 5.000000e-01 : f32
    %481 = vector.broadcast %cst_87 : f32 to vector<8x32xf32>
    %482 = arith.mulf %480, %481 : vector<8x32xf32>
    %483 = vector.extract_strided_slice %372 {offsets = [0, 0], sizes = [8, 32], strides = [1, 1]} : vector<8x64xf32> to vector<8x32xf32>
    %484 = vector.extract_strided_slice %372 {offsets = [0, 32], sizes = [8, 32], strides = [1, 1]} : vector<8x64xf32> to vector<8x32xf32>
    %485 = arith.addf %483, %484 : vector<8x32xf32>
    %cst_88 = arith.constant 5.000000e-01 : f32
    %486 = vector.broadcast %cst_88 : f32 to vector<8x32xf32>
    %487 = arith.mulf %485, %486 : vector<8x32xf32>
    %488 = vector.extract_strided_slice %392 {offsets = [0, 0], sizes = [8, 32], strides = [1, 1]} : vector<8x64xf32> to vector<8x32xf32>
    %489 = vector.extract_strided_slice %392 {offsets = [0, 32], sizes = [8, 32], strides = [1, 1]} : vector<8x64xf32> to vector<8x32xf32>
    %490 = arith.addf %488, %489 : vector<8x32xf32>
    %cst_89 = arith.constant 5.000000e-01 : f32
    %491 = vector.broadcast %cst_89 : f32 to vector<8x32xf32>
    %492 = arith.mulf %490, %491 : vector<8x32xf32>
    %493 = vector.extract_strided_slice %412 {offsets = [0, 0], sizes = [8, 32], strides = [1, 1]} : vector<8x64xf32> to vector<8x32xf32>
    %494 = vector.extract_strided_slice %412 {offsets = [0, 32], sizes = [8, 32], strides = [1, 1]} : vector<8x64xf32> to vector<8x32xf32>
    %495 = arith.addf %493, %494 : vector<8x32xf32>
    %cst_90 = arith.constant 5.000000e-01 : f32
    %496 = vector.broadcast %cst_90 : f32 to vector<8x32xf32>
    %497 = arith.mulf %495, %496 : vector<8x32xf32>
    %498 = vector.extract_strided_slice %432 {offsets = [0, 0], sizes = [8, 32], strides = [1, 1]} : vector<8x64xf32> to vector<8x32xf32>
    %499 = vector.extract_strided_slice %432 {offsets = [0, 32], sizes = [8, 32], strides = [1, 1]} : vector<8x64xf32> to vector<8x32xf32>
    %500 = arith.addf %498, %499 : vector<8x32xf32>
    %cst_91 = arith.constant 5.000000e-01 : f32
    %501 = vector.broadcast %cst_91 : f32 to vector<8x32xf32>
    %502 = arith.mulf %500, %501 : vector<8x32xf32>
    %503 = vector.extract_strided_slice %452 {offsets = [0, 0], sizes = [8, 32], strides = [1, 1]} : vector<8x64xf32> to vector<8x32xf32>
    %504 = vector.extract_strided_slice %452 {offsets = [0, 32], sizes = [8, 32], strides = [1, 1]} : vector<8x64xf32> to vector<8x32xf32>
    %505 = arith.addf %503, %504 : vector<8x32xf32>
    %cst_92 = arith.constant 5.000000e-01 : f32
    %506 = vector.broadcast %cst_92 : f32 to vector<8x32xf32>
    %507 = arith.mulf %505, %506 : vector<8x32xf32>
    %508 = vector.extract_strided_slice %472 {offsets = [0, 0], sizes = [8, 32], strides = [1, 1]} : vector<8x64xf32> to vector<8x32xf32>
    %509 = vector.extract_strided_slice %472 {offsets = [0, 32], sizes = [8, 32], strides = [1, 1]} : vector<8x64xf32> to vector<8x32xf32>
    %510 = arith.addf %508, %509 : vector<8x32xf32>
    %cst_93 = arith.constant 5.000000e-01 : f32
    %511 = vector.broadcast %cst_93 : f32 to vector<8x32xf32>
    %512 = arith.mulf %510, %511 : vector<8x32xf32>
    %513 = tpu.concatenate %477, %482, %487, %492, %497, %502, %507, %512 in 1 : vector<8x32xf32>, vector<8x32xf32>, vector<8x32xf32>, vector<8x32xf32>, vector<8x32xf32>, vector<8x32xf32>, vector<8x32xf32>, vector<8x32xf32> -> vector<8x256xf32>
    %c0_94 = arith.constant 0 : index
    %c0_95 = arith.constant 0 : index
    %514 = vector.load %arg8[%c0_94, %c0_95] : memref<8x256xf32, #tpu.memory_space<vmem>>, vector<8x256xf32>
    tpu.vector_store %arg8[%c0_94, %c0_95], %513 {strides = array<i32>} : memref<8x256xf32, #tpu.memory_space<vmem>>, vector<8x256xf32>,
    return
  }
  func.func @transform_0(%arg0: i32) -> (i32, i32) {
    %c0_i32 = arith.constant 0 : i32
    %c0_i32_0 = arith.constant 0 : i32
    %c0_i32_1 = arith.constant 0 : i32
    return %c0_i32, %c0_i32_0 : i32, i32
  }
  func.func @transform_1(%arg0: i32) -> (i32, i32) {
    %c0_i32 = arith.constant 0 : i32
    %c0_i32_0 = arith.constant 0 : i32
    %c0_i32_1 = arith.constant 0 : i32
    return %c0_i32, %c0_i32_0 : i32, i32
  }
  func.func @transform_2(%arg0: i32) -> (i32, i32) {
    %c0_i32 = arith.constant 0 : i32
    %c0_i32_0 = arith.constant 0 : i32
    %c0_i32_1 = arith.constant 0 : i32
    return %c0_i32, %c0_i32_0 : i32, i32
  }
  func.func @transform_3(%arg0: i32) -> (i32, i32) {
    %c0_i32 = arith.constant 0 : i32
    %c0_i32_0 = arith.constant 0 : i32
    %c0_i32_1 = arith.constant 0 : i32
    return %c0_i32, %c0_i32_0 : i32, i32
  }
  func.func @transform_4(%arg0: i32) -> (i32, i32) {
    %c0_i32 = arith.constant 0 : i32
    %c0_i32_0 = arith.constant 0 : i32
    %c0_i32_1 = arith.constant 0 : i32
    return %c0_i32, %c0_i32_0 : i32, i32
  }
  func.func @transform_5(%arg0: i32) -> (i32, i32) {
    %c0_i32 = arith.constant 0 : i32
    %c0_i32_0 = arith.constant 0 : i32
    %c0_i32_1 = arith.constant 0 : i32
    return %c0_i32, %c0_i32_0 : i32, i32
  }
  func.func @transform_6(%arg0: i32) -> (i32, i32) {
    %c0_i32 = arith.constant 0 : i32
    %c0_i32_0 = arith.constant 0 : i32
    %c0_i32_1 = arith.constant 0 : i32
    return %c0_i32, %c0_i32_0 : i32, i32
  }
  func.func @transform_7(%arg0: i32) -> (i32, i32) {
    %c0_i32 = arith.constant 0 : i32
    %c0_i32_0 = arith.constant 0 : i32
    %c0_i32_1 = arith.constant 0 : i32
    return %c0_i32, %c0_i32_0 : i32, i32
  }
}

</mosaic_0001>

<bundles_post_ra>
// kernel: tpu_custom_call.1
= control target key start
LH: loop header
LB: loop body
LE: loop exit
PB: predicated region body
PF: predicated region fallthrough
CT: control target
= control target key end

     0   :  { %12 = vsyncpa [#allocation3], 0  ;;  %s3571_s0 = inlined_call_operand.hbm [shape: f32[8,128], index: 0, kind: input, shape index: {}]   ;;  %s3572_s1 = inlined_call_operand.hbm [shape: f32[16,256], index: 1, kind: input, shape index: {}]   ;;  %s3573_s2 = inlined_call_operand.hbm [shape: f32[64,256], index: 2, kind: input, shape index: {}]   ;;  %s3574_s3 = inlined_call_operand.vmem [shape: f32[1,256], index: 3, kind: input, shape index: {}]   ;;  %s3575_s4 = inlined_call_operand.hbm [shape: f32[64,256], index: 4, kind: input, shape index: {}]   ;;  %s3576_s5 = inlined_call_operand.hbm [shape: f32[64,256], index: 5, kind: input, shape index: {}]   ;;  %s3577_s6 = inlined_call_operand.vmem [shape: f32[1,256], index: 6, kind: input, shape index: {}]   ;;  %s3578_s7 = inlined_call_operand.hbm [shape: f32[8,256], index: 7, kind: output, shape index: {}]  }
   0x1   :  { %13 = vsyncpa [#allocation6], 0 }
   0x2   :  { %14 = vsyncpa [#allocation9], 0 }
   0x3   :  { %15 = vsyncpa [#allocation4], 0  ;;  %s2622_s24 = smov [#allocation5]  }
   0x4   :  { %s31_s25 = sshll.u32 %s2622_s24, 4  ;;  %s32_s25 = int_to_ptr.vmem [resolvable:$true] %s31_s25 }
   0x5   :  { %s2502_s26 = scalar_lea.vmem %s32_s25, 512  ;;  %p2507_p1 = scmp.lt.s32.totalorder %s32_s25, %s32_s25 }
   0x6   :  { %p2503_p0 = scmp.ne.s32.totalorder %s32_s25, %s2502_s26  ;;  %p2508_p2 = scmp.lt.s32.totalorder %s2502_s26, %s2502_s26 }
   0x8   :  { %p2509_p3 = por %p2508_p2, %p2507_p1 }
   0xa   :  { %p2510_p4 = pnand %p2509_p3, %p2503_p0 }
   0xc   :  { %2513 = shalt.err (!%p2510_p4)
}
   0xd   :  { %s2623_s27 = smov 256   ;;  %s2624_s28 = smov 16  }
   0xe   :  { %37 = dma.hbm_to_vmem [thread:$0]  %s3572_s1, 512, %s32_s25, [#allocation6], %s2623_s27, %s2623_s27, %s2624_s28  }
   0xf   :  { %s2625_s8 = smov [#allocation8]   ;;  %s2626_s10 = smov [#allocation2]  }
  0x10   :  { %s57_s9 = sshll.u32 %s2625_s8, 4  ;;  %s22_s11 = sshll.u32 %s2626_s10, 4  ;;  %s58_s9 = int_to_ptr.vmem [resolvable:$true] %s57_s9  ;;  %s23_s11 = int_to_ptr.vmem [resolvable:$true] %s22_s11 }
  0x11   :  { %s2522_s12 = scalar_lea.vmem %s58_s9, 2048  ;;  %p2527_p6 = scmp.lt.s32.totalorder %s58_s9, %s58_s9 }
  0x12   :  { %p2523_p5 = scmp.ne.s32.totalorder %s58_s9, %s2522_s12  ;;  %p2528_p7 = scmp.lt.s32.totalorder %s2522_s12, %s2522_s12 }
  0x14   :  { %p2529_p8 = por %p2528_p7, %p2527_p6 }
  0x16   :  { %p2530_p9 = pnand %p2529_p8, %p2523_p5 }
  0x18   :  { %2533 = shalt.err (!%p2530_p9)
}
  0x19   :  { %63 = dma.hbm_to_vmem [thread:$0]  %s3575_s4, 2048, %s58_s9, [#allocation9], %s2623_s27, %s2623_s27, %s2624_s28  }
  0x1a   :  { %s2542_s1 = scalar_lea.vmem %s23_s11, 128  ;;  %p2547_p11 = scmp.lt.s32.totalorder %s23_s11, %s23_s11 }
  0x1b   :  { %p2543_p10 = scmp.ne.s32.totalorder %s23_s11, %s2542_s1  ;;  %p2548_p12 = scmp.lt.s32.totalorder %s2542_s1, %s2542_s1 }
  0x1d   :  { %p2549_p13 = por %p2548_p12, %p2547_p11 }
  0x1f   :  { %p2550_p0 = pnand %p2549_p13, %p2543_p10 }
  0x21   :  { %2553 = shalt.err (!%p2550_p0)
}
  0x22   :  { %25 = dma.hbm_to_vmem [thread:$0]  %s3571_s0, 128, %s23_s11, [#allocation3]  }
  0x23   :  { %s2627_s17 = smov [#allocation7]   ;;  %s2628_s19 = smov [#allocation10]  }
  0x24   :  { %s43_s18 = sshll.u32 %s2627_s17, 4  ;;  %s69_s20 = sshll.u32 %s2628_s19, 4  ;;  %s44_s18 = int_to_ptr.vmem [resolvable:$true] %s43_s18  ;;  %s70_s20 = int_to_ptr.vmem [resolvable:$true] %s69_s20 }
  0x25   :  { %s2562_s21 = scalar_lea.vmem %s44_s18, 2048  ;;  %p2567_p2 = scmp.lt.s32.totalorder %s44_s18, %s44_s18 }
  0x26   :  { %p2563_p1 = scmp.ne.s32.totalorder %s44_s18, %s2562_s21  ;;  %p2568_p3 = scmp.lt.s32.totalorder %s2562_s21, %s2562_s21 }
  0x28   :  { %p2569_p4 = por %p2568_p3, %p2567_p2 }
  0x2a   :  { %p2570_p5 = pnand %p2569_p4, %p2563_p1 }
  0x2c   :  { %2573 = shalt.err (!%p2570_p5)
}
  0x2d   :  { %49 = dma.hbm_to_vmem [thread:$0]  %s3573_s2, 2048, %s44_s18, [#allocation6], %s2623_s27, %s2623_s27, %s2624_s28  }
  0x2e   :  { %s2582_s0 = scalar_lea.vmem %s70_s20, 2048  ;;  %p2587_p7 = scmp.lt.s32.totalorder %s70_s20, %s70_s20 }
  0x2f   :  { %p2583_p6 = scmp.ne.s32.totalorder %s70_s20, %s2582_s0  ;;  %p2588_p8 = scmp.lt.s32.totalorder %s2582_s0, %s2582_s0 }
  0x31   :  { %p2589_p9 = por %p2588_p8, %p2587_p7 }
  0x33   :  { %p2590_p10 = pnand %p2589_p9, %p2583_p6 }
  0x35   :  { %2593 = shalt.err (!%p2590_p10)
}
  0x36   :  { %75 = dma.hbm_to_vmem [thread:$0]  %s3576_s5, 2048, %s70_s20, [#allocation9], %s2623_s27, %s2623_s27, %s2624_s28  }
  0x37   :  { %2614 = dma.done.wait [#allocation3], 128  }
  0x38   :  { %2615 = vsyncadd [#allocation3], 4294967168 }
  0x39   :  { %2616 = dma.done.wait [#allocation6], 2560  }
  0x3a   :  { %2617 = vsyncadd [#allocation6], 4294964736 }
  0x3b   :  { %2618 = dma.done.wait [#allocation9], 4096  }
  0x3c   :  { %2619 = vsyncadd [#allocation9], 4294963200  ;;  %v2629_v0 = vmov 0.0   ;;  %v123_v1 = vld [vmem:[#allocation2] sm:$0xff]  ;;  %v141_v3 = vld [vmem:[#allocation5 + $0x10] sm:$0xff]  ;;  %s2630_s2 = smov 112   ;;  %v93_v31 = vlaneseq }
  0x3d   :  { %252 = vmatprep.mubr.f32.mxu0 %v2629_v0  ;;  %389 = vmatprep.mubr.f32.mxu1 %v2629_v0  ;;  %v142_v2 = vld [vmem:[#allocation5 + $0x18] sm:$0xff]  ;;  %s2631_s25 = smov 80   ;;  %v140_v4 = vld [vmem:[#allocation5 + $0x8] sm:$0xff]  ;;  %v2709_v6 = vld [vmem:[#allocation7 + $0x70] sm:$0xff]  ;;  %vm171_vm0 = vcmask 130048   ;;  %s2632_s5 = smov 96  }
  0x3e   :  { %125 = vrot.lane.b32.xlu0 %v123_v1, %s2630_s2  ;;  %129 = vrot.lane.b32.xlu1 %v123_v1, %s2631_s25  ;;  %v2706_v5 = vld [vmem:[#allocation7 + $0x78] sm:$0xff]  ;;  %v2711_v7 = vld [vmem:[#allocation7 + $0x68] sm:$0xff]  ;;  %v139_v8 = vld [vmem:[#allocation5] sm:$0xff]  ;;  %s2633_s26 = smov 64   ;;  %s2634_s27 = smov 48   ;;  %v2810_v33 = vand.u32 127, %v93_v31 }
  0x3f   :  { %216 = vmatprep.subr.mxu0 %v142_v2  ;;  %341 = vmatprep.subr.mxu1 %v2706_v5  ;;  %v2714_v9 = vld [vmem:[#allocation7 + $0x60] sm:$0xff]  ;;  %v2717_v10 = vld [vmem:[#allocation7 + $0x58] sm:$0xff]  ;;  %v2721_v11 = vld [vmem:[#allocation7 + $0x50] sm:$0xff]  ;;  %s2635_s29 = smov 32   ;;  %v2812_v35 = vshrl.u32 %v93_v31, 7  ;;  %vm321_vm3 = vcmask 523264  }
  0x40   :  { %217 = vmatpush1.msra.mxu0 %v141_v3  ;;  %342 = vmatpush1.msra.mxu1 %v2709_v6  ;;  %v2726_v12 = vld [vmem:[#allocation7 + $0x48] sm:$0xff]  ;;  %v2730_v13 = vld [vmem:[#allocation7 + $0x40] sm:$0xff]  ;;  %v2733_v14 = vld [vmem:[#allocation7 + $0x38] sm:$0xff]  ;;  %v95_v37 = vadd.s32 128, %v2810_v33  ;;  %v100_v40 = vand.u32 63, %v2810_v33  ;;  %vm122_vm4 = vcmp.lt.s32.totalorder %v2810_v33, 32 }
  0x41   :  { %218 = vmatprep.subr.mxu0 %v140_v4  ;;  %343 = vmatprep.subr.mxu1 %v2711_v7  ;;  %v2736_v15 = vld [vmem:[#allocation7 + $0x30] sm:$0xff]  ;;  %v2740_v16 = vld [vmem:[#allocation7 + $0x28] sm:$0xff]  ;;  %v2744_v17 = vld [vmem:[#allocation7 + $0x20] sm:$0xff]  ;;  %v3580_v39 = vsub.s32 0, %v2812_v35  ;;  %v3579_v43 = vsub.s32 1, %v2812_v35  ;;  %vm2214_vm5 = vcmask 261120  }
  0x42   :  { %127 = vrot.lane.b32.xlu0 %v123_v1, %s2632_s5  ;;  %131 = vrot.lane.b32.xlu1 %v123_v1, %s2633_s26  ;;  %v2749_v18 = vld [vmem:[#allocation7 + $0x18] sm:$0xff]  ;;  %v2752_v19 = vld [vmem:[#allocation7 + $0x10] sm:$0xff]  ;;  %v2756_v20 = vld [vmem:[#allocation7 + $0x8] sm:$0xff]  ;;  %v107_v44 = vand.u32 63, %v95_v37  ;;  %vm2823_vm1 = vcmp.lt.s32.totalorder %v100_v40, 32  ;;  %vm2217_vm6 = vcmask 785408  }
  0x43   :  { %219 = vmatpush1.msra.mxu0 %v139_v8  ;;  %344 = vmatpush1.msra.mxu1 %v2714_v9  ;;  %v2760_v21 = vld [vmem:[#allocation7] sm:$0xff]  ;;  %v159_v41 = vld [vmem:[%s3574_s3] sm:$0x3] }
  0x44   :  { %2241 = vmatmul.mubr.msk.f32.vlgmr.msra.gmra.mxu0 %vm171_vm0, %v123_v1  ;;  %345 = vmatprep.subr.mxu1 %v2717_v10  ;;  %v164_v46 = vrot.slane %v159_v41, %v3580_v39  ;;  %v168_v49 = vrot.slane %v159_v41, %v3579_v43  ;;  %vm2833_vm2 = vcmp.lt.s32.totalorder %v107_v44, 32 }
  0x45   :  { %258 = vmatprep.mubr.f32.mxu0 %v2629_v0  ;;  %346 = vmatpush1.msra.mxu1 %v2721_v11 }
  0x46   :  { %133 = vrot.lane.b32.xlu0 %v123_v1, %s2634_s27  ;;  %135 = vrot.lane.b32.xlu1 %v123_v1, %s2635_s29 }
  0x47   :  { %347 = vmatprep.subr.mxu1 %v2726_v12  ;;  %543 = vmatprep.subr.mxu0 %v2706_v5 }
  0x48   :  { %348 = vmatpush1.msra.mxu1 %v2730_v13  ;;  %544 = vmatpush1.msra.mxu0 %v2709_v6 }
  0x49   :  { %349 = vmatprep.subr.mxu1 %v2733_v14  ;;  %545 = vmatprep.subr.mxu0 %v2711_v7 }
  0x4a   :  { %137 = vrot.lane.b32.xlu0 %v123_v1, %s2624_s28  ;;  %350 = vmatpush1.msra.mxu1 %v2736_v15 }
  0x4b   :  { %351 = vmatprep.subr.mxu1 %v2740_v16  ;;  %546 = vmatpush1.msra.mxu0 %v2714_v9 }
  0x4c   :  { %352 = vmatpush1.msra.mxu1 %v2744_v17  ;;  %547 = vmatprep.subr.mxu0 %v2717_v10 }
  0x4d   :  { %353 = vmatprep.subr.mxu1 %v2749_v18  ;;  %548 = vmatpush1.msra.mxu0 %v2721_v11 }
  0x4e   :  { %354 = vmatpush1.msra.mxu1 %v2752_v19  ;;  %549 = vmatprep.subr.mxu0 %v2726_v12 }
  0x4f   :  { %355 = vmatprep.subr.mxu1 %v2756_v20  ;;  %550 = vmatpush1.msra.mxu0 %v2730_v13 }
  0x50   :  { %356 = vmatpush1.msra.mxu1 %v2760_v21  ;;  %551 = vmatprep.subr.mxu0 %v2733_v14 }
  0x51   :  { %390 = vmatmul.mubr.f32.vlgmr.msra.gmra.mxu1 %v2629_v0  ;;  %442 = vmatprep.subr.mxu1 %v2706_v5 }
  0x52   :  { %443 = vmatpush1.msra.mxu1 %v2709_v6  ;;  %490 = vmatprep.mubr.f32.mxu1 %v2629_v0 }
  0x53   :  { %444 = vmatprep.subr.mxu1 %v2711_v7  ;;  %552 = vmatpush1.msra.mxu0 %v2736_v15 }
  0x54   :  { %445 = vmatpush1.msra.mxu1 %v2714_v9  ;;  %553 = vmatprep.subr.mxu0 %v2740_v16 }
  0x55   :  { %446 = vmatprep.subr.mxu1 %v2717_v10  ;;  %554 = vmatpush1.msra.mxu0 %v2744_v17 }
  0x56   :  { %447 = vmatpush1.msra.mxu1 %v2721_v11  ;;  %555 = vmatprep.subr.mxu0 %v2749_v18 }
  0x57   :  { %448 = vmatprep.subr.mxu1 %v2726_v12  ;;  %556 = vmatpush1.msra.mxu0 %v2752_v19 }
  0x58   :  { %449 = vmatpush1.msra.mxu1 %v2730_v13  ;;  %557 = vmatprep.subr.mxu0 %v2756_v20 }
  0x59   :  { %450 = vmatprep.subr.mxu1 %v2733_v14  ;;  %558 = vmatpush1.msra.mxu0 %v2760_v21 }
  0x5a   :  { %451 = vmatpush1.msra.mxu1 %v2736_v15  ;;  %745 = vmatprep.subr.mxu0 %v2706_v5 }
  0x5b   :  { %452 = vmatprep.subr.mxu1 %v2740_v16 }
  0x5c   :  { %453 = vmatpush1.msra.mxu1 %v2744_v17 }
  0x5d   :  { %454 = vmatprep.subr.mxu1 %v2749_v18 }
  0x5e   :  { %455 = vmatpush1.msra.mxu1 %v2752_v19 }
  0x5f   :  { %456 = vmatprep.subr.mxu1 %v2756_v20 }
  0x60   :  { %457 = vmatpush1.msra.mxu1 %v2760_v21 }
  0x61   :  { %644 = vmatprep.subr.mxu1 %v2706_v5 }
  0xb0   :  { %v126_v22 = vpop.permute.xlu0 %125  ;;  %v130_v24 = vpop.permute.xlu1 %129 }
  0xb1   :  { %2242 = vmatmul.mubr.msk.f32.gmra.mxu0 %vm171_vm0, %v126_v22 }
  0xb2   :  { %264 = vmatprep.mubr.f32.mxu0 %v2629_v0 }
  0xb4   :  { %v128_v23 = vpop.permute.xlu0 %127  ;;  %v132_v25 = vpop.permute.xlu1 %131 }
  0xb5   :  { %2243 = vmatmul.mubr.msk.f32.gmra.mxu0 %vm171_vm0, %v128_v23 }
  0xb6   :  { %270 = vmatprep.mubr.f32.mxu0 %v2629_v0 }
  0xb8   :  { %v134_v26 = vpop.permute.xlu0 %133  ;;  %v136_v27 = vpop.permute.xlu1 %135 }
  0xb9   :  { %2244 = vmatmul.mubr.msk.f32.gmra.mxu0 %vm171_vm0, %v130_v24 }
  0xba   :  { %276 = vmatprep.mubr.f32.mxu0 %v2629_v0 }
  0xbc   :  { %v138_v28 = vpop.permute.xlu0 %137 }
  0xbd   :  { %2245 = vmatmul.mubr.msk.f32.gmra.mxu0 %vm171_vm0, %v132_v25 }
  0xbe   :  { %282 = vmatprep.mubr.f32.mxu0 %v2629_v0 }
  0xc1   :  { %2246 = vmatmul.mubr.msk.f32.gmra.mxu0 %vm171_vm0, %v134_v26 }
  0xc2   :  { %288 = vmatprep.mubr.f32.mxu0 %v2629_v0 }
  0xc5   :  { %2247 = vmatmul.mubr.msk.f32.gmra.mxu0 %vm171_vm0, %v136_v27 }
  0xc6   :  { %294 = vmatprep.mubr.f32.mxu0 %v2629_v0 }
  0xc9   :  { %2248 = vmatmul.mubr.msk.f32.gmra.mxu0 %vm171_vm0, %v138_v28 }
  0xca   :  { %591 = vmatprep.mubr.f32.mxu0 %v2629_v0 }
 0x104   :  { %v254_v29 = vpop.f32.mrf.mxu0 }
 0x105   :  { %v2897_v37 = vadd.f32 %v254_v29, %v164_v46 }
 0x106   :  { %v256_v30 = vpop.f32.mrf.mxu0 }
 0x107   :  { %v2909_v44 = vadd.f32 %v256_v30, %v168_v49 }
 0x111   :  { %v391_v40 = vpop.f32.mrf.mxu1 }
 0x113   :  { %v393_v30 = vpop.f32.mrf.mxu1 }
 0x171   :  { %v260_v32 = vpop.f32.mrf.mxu0 }
 0x172   :  { %v2873_v22 = vadd.f32 %v260_v32, %v164_v46 }
 0x173   :  { %v262_v34 = vpop.f32.mrf.mxu0 }
 0x174   :  { %v2885_v27 = vadd.f32 %v262_v34, %v168_v49 }
 0x175   :  { %v266_v36 = vpop.f32.mrf.mxu0 }
 0x176   :  { %v2849_v59 = vadd.f32 %v266_v36, %v164_v46 }
 0x177   :  { %v268_v38 = vpop.f32.mrf.mxu0 }
 0x178   :  { %v2861_v1 = vadd.f32 %v268_v38, %v168_v49 }
 0x179   :  { %v272_v42 = vpop.f32.mrf.mxu0 }
 0x17a   :  { %v2829_v50 = vadd.f32 %v272_v42, %v164_v46 }
 0x17b   :  { %v274_v45 = vpop.f32.mrf.mxu0 }
 0x17c   :  { %v2837_v54 = vadd.f32 %v274_v45, %v168_v49 }
 0x17d   :  { %v278_v48 = vpop.f32.mrf.mxu0 }
 0x17e   :  { %v2831_v51 = vadd.f32 %v278_v48, %v164_v46 }
 0x17f   :  { %v280_v53 = vpop.f32.mrf.mxu0 }
 0x180   :  { %v2839_v55 = vadd.f32 %v280_v53, %v168_v49  ;;  %v311_v56 = vsel %vm2823_vm1, %v2829_v50, %v2831_v51  ;;  %v313_v57 = vsel %vm2823_vm1, %v2831_v51, %v2829_v50 }
 0x181   :  { %v284_v58 = vpop.f32.mrf.mxu0 }
 0x182   :  { %v2851_v60 = vadd.f32 %v284_v58, %v164_v46  ;;  %v312_v61 = vsel %vm2833_vm2, %v2837_v54, %v2839_v55  ;;  %v314_v62 = vsel %vm2833_vm2, %v2839_v55, %v2837_v54 }
 0x183   :  { %v286_v63 = vpop.f32.mrf.mxu0 }
 0x184   :  { %v2863_v2 = vadd.f32 %v286_v63, %v168_v49  ;;  %v309_v3 = vsel %vm2823_vm1, %v2849_v59, %v2851_v60  ;;  %v315_v4 = vsel %vm2823_vm1, %v2851_v60, %v2849_v59 }
 0x185   :  { %v290_v8 = vpop.f32.mrf.mxu0 }
 0x186   :  { %v2875_v23 = vadd.f32 %v290_v8, %v164_v46  ;;  %v310_v24 = vsel %vm2833_vm2, %v2861_v1, %v2863_v2  ;;  %v316_v25 = vsel %vm2833_vm2, %v2863_v2, %v2861_v1 }
 0x187   :  { %v292_v26 = vpop.f32.mrf.mxu0 }
 0x188   :  { %v2887_v28 = vadd.f32 %v292_v26, %v168_v49  ;;  %v307_v31 = vsel %vm2823_vm1, %v2873_v22, %v2875_v23 }
 0x189   :  { %v296_v36 = vpop.f32.mrf.mxu0 }
 0x18a   :  { %v2899_v38 = vadd.f32 %v296_v36, %v164_v46  ;;  %v308_v34 = vsel %vm2833_vm2, %v2885_v27, %v2887_v28 }
 0x18b   :  { %v298_v42 = vpop.f32.mrf.mxu0 }
 0x18c   :  { %v305_v29 = vsel %vm2823_vm1, %v2897_v37, %v2899_v38  ;;  %v2915_v45 = vadd.f32 %v298_v42, %v168_v49 }
 0x18d   :  { %v396_v48 = vadd.f32 %v391_v40, %v305_v29 }
 0x18e   :  { %v306_v53 = vsel %vm2833_vm2, %v2909_v44, %v2915_v45 }
 0x18f   :  { %v2249_v63 = vmul.f32 -1.442695, %v396_v48  ;;  %v397_v49 = vadd.f32 %v393_v30, %v306_v53 }
 0x191   :  { %v2250_v8 = vmul.f32 -1.442695, %v397_v49  ;;  %2334 = vpow2.f32 %v2249_v63 }
 0x193   :  { %2336 = vpow2.f32 %v2250_v8 }
 0x19e   :  { %v2335_v26 = vpop.eup %2334 }
 0x19f   :  { %v404_v40 = vadd.f32 1.0, %v2335_v26 }
 0x1a0   :  { %v2337_v36 = vpop.eup %2336 }
 0x1a1   :  { %v405_v42 = vadd.f32 1.0, %v2337_v36 }
 0x1a3   :  { %2338 = vrcp.f32 %v405_v42 }
 0x1a4   :  { %2340 = vrcp.f32 %v404_v40 }
 0x1b0   :  { %v2339_v29 = vpop.eup %2338 }
 0x1b1   :  { %v410_v43 = vmul.f32 2.0, %v2339_v29  ;;  %v2341_v46 = vpop.eup %2340 }
 0x1b2   :  { %v412_v32 = vmul.f32 0.0, %v2341_v46 }
 0x1b3   :  { %v2251_v39 = vadd.f32 -1.0, %v410_v43 }
 0x1b5   :  { %v413_v41 = vmul.f32 %v2341_v46, %v2251_v39 }
 0x1b7   :  { %415 = vrot.lane.b32.xlu1 %v413_v41, %s2633_s26 }
 0x229   :  { %v416_v58 = vpop.permute.xlu1 %415 }
 0x22a   :  { %v418_v48 = vadd.f32 %v416_v58, %v412_v32 }
 0x22c   :  { %2342 = vtanh.f32 %v418_v48 }
 0x239   :  { %v2343_v53 = vpop.eup %2342 }
 0x23a   :  { %v420_v30 = vmul.f32 %v2343_v53, %v2339_v29 }
 0x23c   :  { %422 = vrot.lane.b32.xlu0 %v420_v30, %s2633_s26 }
 0x2ae   :  { %v2931_v63 = vpop.permute.xlu0 %422 }
 0x2af   :  { %2252 = vmatmul.mubr.msk.f32.vlgmr.msra.gmra.mxu1 %vm321_vm3, %v2931_v63 }
 0x2b0   :  { %645 = vmatpush1.msra.mxu1 %v2709_v6  ;;  %692 = vmatprep.mubr.f32.mxu1 %v2629_v0 }
 0x2b1   :  { %646 = vmatprep.subr.mxu1 %v2711_v7 }
 0x2b2   :  { %647 = vmatpush1.msra.mxu1 %v2714_v9 }
 0x2b3   :  { %648 = vmatprep.subr.mxu1 %v2717_v10 }
 0x2b4   :  { %649 = vmatpush1.msra.mxu1 %v2721_v11 }
 0x2b5   :  { %650 = vmatprep.subr.mxu1 %v2726_v12 }
 0x2b6   :  { %651 = vmatpush1.msra.mxu1 %v2730_v13 }
 0x2b7   :  { %652 = vmatprep.subr.mxu1 %v2733_v14 }
 0x2b8   :  { %653 = vmatpush1.msra.mxu1 %v2736_v15 }
 0x2b9   :  { %654 = vmatprep.subr.mxu1 %v2740_v16 }
 0x2ba   :  { %655 = vmatpush1.msra.mxu1 %v2744_v17 }
 0x2bb   :  { %656 = vmatprep.subr.mxu1 %v2749_v18 }
 0x2bc   :  { %657 = vmatpush1.msra.mxu1 %v2752_v19 }
 0x2bd   :  { %658 = vmatprep.subr.mxu1 %v2756_v20 }
 0x2be   :  { %659 = vmatpush1.msra.mxu1 %v2760_v21 }
 0x2bf   :  { %846 = vmatprep.subr.mxu1 %v2706_v5 }
 0x36f   :  { %v492_v39 = vpop.f32.mrf.mxu1 }
 0x370   :  { %v497_v43 = vadd.f32 %v492_v39, %v307_v31 }
 0x371   :  { %v494_v32 = vpop.f32.mrf.mxu1 }
 0x372   :  { %v2253_v41 = vmul.f32 -1.442695, %v497_v43  ;;  %v498_v46 = vadd.f32 %v494_v32, %v308_v34 }
 0x374   :  { %v2254_v58 = vmul.f32 -1.442695, %v498_v46  ;;  %2344 = vpow2.f32 %v2253_v41 }
 0x376   :  { %2346 = vpow2.f32 %v2254_v58 }
 0x381   :  { %v2345_v49 = vpop.eup %2344 }
 0x382   :  { %v505_v36 = vadd.f32 1.0, %v2345_v49 }
 0x383   :  { %v2347_v8 = vpop.eup %2346 }
 0x384   :  { %v506_v26 = vadd.f32 1.0, %v2347_v8 }
 0x386   :  { %2348 = vrcp.f32 %v506_v26 }
 0x387   :  { %2350 = vrcp.f32 %v505_v36 }
 0x393   :  { %v2349_v42 = vpop.eup %2348 }
 0x394   :  { %v511_v40 = vmul.f32 2.0, %v2349_v42  ;;  %v2351_v53 = vpop.eup %2350 }
 0x395   :  { %v513_v31 = vmul.f32 %v2351_v53, %v418_v48 }
 0x396   :  { %v2255_v29 = vadd.f32 -1.0, %v511_v40 }
 0x398   :  { %v514_v30 = vmul.f32 %v2351_v53, %v2255_v29 }
 0x39a   :  { %516 = vrot.lane.b32.xlu1 %v514_v30, %s2633_s26 }
 0x40c   :  { %v517_v39 = vpop.permute.xlu1 %516 }
 0x40d   :  { %v519_v43 = vadd.f32 %v517_v39, %v513_v31 }
 0x40f   :  { %2352 = vtanh.f32 %v519_v43 }
 0x41c   :  { %v2353_v34 = vpop.eup %2352 }
 0x41d   :  { %v521_v32 = vmul.f32 %v2353_v34, %v2349_v42 }
 0x41f   :  { %523 = vrot.lane.b32.xlu0 %v521_v32, %s2633_s26 }
 0x491   :  { %v2954_v41 = vpop.permute.xlu0 %523 }
 0x492   :  { %2256 = vmatmul.mubr.msk.f32.vlgmr.msra.gmra.mxu0 %vm321_vm3, %v2954_v41 }
 0x493   :  { %746 = vmatpush1.msra.mxu0 %v2709_v6  ;;  %793 = vmatprep.mubr.f32.mxu0 %v2629_v0 }
 0x494   :  { %747 = vmatprep.subr.mxu0 %v2711_v7 }
 0x495   :  { %748 = vmatpush1.msra.mxu0 %v2714_v9 }
 0x496   :  { %749 = vmatprep.subr.mxu0 %v2717_v10 }
 0x497   :  { %750 = vmatpush1.msra.mxu0 %v2721_v11 }
 0x498   :  { %751 = vmatprep.subr.mxu0 %v2726_v12 }
 0x499   :  { %752 = vmatpush1.msra.mxu0 %v2730_v13 }
 0x49a   :  { %753 = vmatprep.subr.mxu0 %v2733_v14 }
 0x49b   :  { %754 = vmatpush1.msra.mxu0 %v2736_v15 }
 0x49c   :  { %755 = vmatprep.subr.mxu0 %v2740_v16 }
 0x49d   :  { %756 = vmatpush1.msra.mxu0 %v2744_v17 }
 0x49e   :  { %757 = vmatprep.subr.mxu0 %v2749_v18 }
 0x49f   :  { %758 = vmatpush1.msra.mxu0 %v2752_v19 }
 0x4a0   :  { %759 = vmatprep.subr.mxu0 %v2756_v20 }
 0x4a1   :  { %760 = vmatpush1.msra.mxu0 %v2760_v21 }
 0x4a2   :  { %947 = vmatprep.subr.mxu0 %v2706_v5 }
 0x552   :  { %v593_v48 = vpop.f32.mrf.mxu0 }
 0x553   :  { %v598_v46 = vadd.f32 %v593_v48, %v309_v3 }
 0x554   :  { %v595_v58 = vpop.f32.mrf.mxu0 }
 0x555   :  { %v2257_v49 = vmul.f32 -1.442695, %v598_v46  ;;  %v599_v8 = vadd.f32 %v595_v58, %v310_v24 }
 0x557   :  { %v2258_v26 = vmul.f32 -1.442695, %v599_v8  ;;  %2354 = vpow2.f32 %v2257_v49 }
 0x559   :  { %2356 = vpow2.f32 %v2258_v26 }
 0x564   :  { %v2355_v36 = vpop.eup %2354 }
 0x565   :  { %v606_v29 = vadd.f32 1.0, %v2355_v36 }
 0x566   :  { %v2357_v42 = vpop.eup %2356 }
 0x567   :  { %v607_v40 = vadd.f32 1.0, %v2357_v42 }
 0x569   :  { %2358 = vrcp.f32 %v607_v40 }
 0x56a   :  { %2360 = vrcp.f32 %v606_v29 }
 0x576   :  { %v2359_v53 = vpop.eup %2358 }
 0x577   :  { %v612_v30 = vmul.f32 2.0, %v2359_v53  ;;  %v2361_v31 = vpop.eup %2360 }
 0x578   :  { %v614_v34 = vmul.f32 %v2361_v31, %v519_v43 }
 0x579   :  { %v2259_v3 = vadd.f32 -1.0, %v612_v30 }
 0x57b   :  { %v615_v39 = vmul.f32 %v2361_v31, %v2259_v3 }
 0x57d   :  { %617 = vrot.lane.b32.xlu1 %v615_v39, %s2633_s26 }
 0x5ef   :  { %v618_v32 = vpop.permute.xlu1 %617 }
 0x5f0   :  { %v620_v48 = vadd.f32 %v618_v32, %v614_v34 }
 0x5f2   :  { %2362 = vtanh.f32 %v620_v48 }
 0x5ff   :  { %v2363_v24 = vpop.eup %2362 }
 0x600   :  { %v622_v46 = vmul.f32 %v2363_v24, %v2359_v53 }
 0x602   :  { %624 = vrot.lane.b32.xlu0 %v622_v46, %s2633_s26 }
 0x674   :  { %v2987_v58 = vpop.permute.xlu0 %624 }
 0x675   :  { %2260 = vmatmul.mubr.msk.f32.vlgmr.msra.gmra.mxu1 %vm321_vm3, %v2987_v58 }
 0x676   :  { %847 = vmatpush1.msra.mxu1 %v2709_v6  ;;  %894 = vmatprep.mubr.f32.mxu1 %v2629_v0 }
 0x677   :  { %848 = vmatprep.subr.mxu1 %v2711_v7 }
 0x678   :  { %849 = vmatpush1.msra.mxu1 %v2714_v9 }
 0x679   :  { %850 = vmatprep.subr.mxu1 %v2717_v10 }
 0x67a   :  { %851 = vmatpush1.msra.mxu1 %v2721_v11 }
 0x67b   :  { %852 = vmatprep.subr.mxu1 %v2726_v12 }
 0x67c   :  { %853 = vmatpush1.msra.mxu1 %v2730_v13 }
 0x67d   :  { %854 = vmatprep.subr.mxu1 %v2733_v14 }
 0x67e   :  { %855 = vmatpush1.msra.mxu1 %v2736_v15 }
 0x67f   :  { %856 = vmatprep.subr.mxu1 %v2740_v16 }
 0x680   :  { %857 = vmatpush1.msra.mxu1 %v2744_v17 }
 0x681   :  { %858 = vmatprep.subr.mxu1 %v2749_v18 }
 0x682   :  { %859 = vmatpush1.msra.mxu1 %v2752_v19 }
 0x683   :  { %860 = vmatprep.subr.mxu1 %v2756_v20 }
 0x684   :  { %861 = vmatpush1.msra.mxu1 %v2760_v21 }
 0x685   :  { %1048 = vmatprep.subr.mxu1 %v2706_v5 }
 0x735   :  { %v694_v43 = vpop.f32.mrf.mxu1 }
 0x736   :  { %v699_v49 = vadd.f32 %v694_v43, %v311_v56 }
 0x737   :  { %v696_v8 = vpop.f32.mrf.mxu1 }
 0x738   :  { %v2261_v26 = vmul.f32 -1.442695, %v699_v49  ;;  %v700_v36 = vadd.f32 %v696_v8, %v312_v61 }
 0x73a   :  { %v2262_v42 = vmul.f32 -1.442695, %v700_v36  ;;  %2364 = vpow2.f32 %v2261_v26 }
 0x73c   :  { %2366 = vpow2.f32 %v2262_v42 }
 0x747   :  { %v2365_v40 = vpop.eup %2364 }
 0x748   :  { %v707_v53 = vadd.f32 1.0, %v2365_v40 }
 0x749   :  { %v2367_v5 = vpop.eup %2366 }
 0x74a   :  { %v708_v29 = vadd.f32 1.0, %v2367_v5 }
 0x74c   :  { %2368 = vrcp.f32 %v708_v29 }
 0x74d   :  { %2370 = vrcp.f32 %v707_v53 }
 0x759   :  { %v2369_v30 = vpop.eup %2368 }
 0x75a   :  { %v713_v3 = vmul.f32 2.0, %v2369_v30  ;;  %v2371_v31 = vpop.eup %2370 }
 0x75b   :  { %v715_v34 = vmul.f32 %v2371_v31, %v620_v48 }
 0x75c   :  { %v2263_v56 = vadd.f32 -1.0, %v713_v3 }
 0x75e   :  { %v716_v39 = vmul.f32 %v2371_v31, %v2263_v56 }
 0x760   :  { %718 = vrot.lane.b32.xlu1 %v716_v39, %s2633_s26 }
 0x7d2   :  { %v719_v32 = vpop.permute.xlu1 %718 }
 0x7d3   :  { %v721_v24 = vadd.f32 %v719_v32, %v715_v34  ;;  %v3585_v32 = vsel %vm2823_vm1, %v2875_v23, %v2873_v22 }
 0x7d5   :  { %2372 = vtanh.f32 %v721_v24 }
 0x7e2   :  { %v2373_v61 = vpop.eup %2372 }
 0x7e3   :  { %v723_v46 = vmul.f32 %v2373_v61, %v2369_v30 }
 0x7e5   :  { %725 = vrot.lane.b32.xlu0 %v723_v46, %s2633_s26 }
 0x857   :  { %v3020_v43 = vpop.permute.xlu0 %725 }
 0x858   :  { %2264 = vmatmul.mubr.msk.f32.vlgmr.msra.gmra.mxu0 %vm321_vm3, %v3020_v43 }
 0x859   :  { %948 = vmatpush1.msra.mxu0 %v2709_v6  ;;  %995 = vmatprep.mubr.f32.mxu0 %v2629_v0 }
 0x85a   :  { %949 = vmatprep.subr.mxu0 %v2711_v7 }
 0x85b   :  { %950 = vmatpush1.msra.mxu0 %v2714_v9 }
 0x85c   :  { %951 = vmatprep.subr.mxu0 %v2717_v10 }
 0x85d   :  { %952 = vmatpush1.msra.mxu0 %v2721_v11 }
 0x85e   :  { %953 = vmatprep.subr.mxu0 %v2726_v12 }
 0x85f   :  { %954 = vmatpush1.msra.mxu0 %v2730_v13 }
 0x860   :  { %955 = vmatprep.subr.mxu0 %v2733_v14 }
 0x861   :  { %956 = vmatpush1.msra.mxu0 %v2736_v15 }
 0x862   :  { %957 = vmatprep.subr.mxu0 %v2740_v16 }
 0x863   :  { %958 = vmatpush1.msra.mxu0 %v2744_v17 }
 0x864   :  { %959 = vmatprep.subr.mxu0 %v2749_v18 }
 0x865   :  { %960 = vmatpush1.msra.mxu0 %v2752_v19 }
 0x866   :  { %961 = vmatprep.subr.mxu0 %v2756_v20 }
 0x867   :  { %962 = vmatpush1.msra.mxu0 %v2760_v21 }
 0x918   :  { %v795_v48 = vpop.f32.mrf.mxu0 }
 0x919   :  { %v800_v49 = vadd.f32 %v795_v48, %v313_v57  ;;  %v3586_v48 = vsel %vm2833_vm2, %v2887_v28, %v2885_v27 }
 0x91a   :  { %v797_v8 = vpop.f32.mrf.mxu0 }
 0x91b   :  { %v2265_v26 = vmul.f32 -1.442695, %v800_v49  ;;  %v801_v36 = vadd.f32 %v797_v8, %v314_v62 }
 0x91d   :  { %v2266_v42 = vmul.f32 -1.442695, %v801_v36  ;;  %2374 = vpow2.f32 %v2265_v26 }
 0x91f   :  { %2376 = vpow2.f32 %v2266_v42 }
 0x92a   :  { %v2375_v40 = vpop.eup %2374 }
 0x92b   :  { %v808_v53 = vadd.f32 1.0, %v2375_v40 }
 0x92c   :  { %v2377_v5 = vpop.eup %2376 }
 0x92d   :  { %v809_v29 = vadd.f32 1.0, %v2377_v5 }
 0x92f   :  { %2378 = vrcp.f32 %v809_v29 }
 0x930   :  { %2380 = vrcp.f32 %v808_v53 }
 0x93c   :  { %v2379_v30 = vpop.eup %2378 }
 0x93d   :  { %v814_v50 = vmul.f32 2.0, %v2379_v30  ;;  %v2381_v57 = vpop.eup %2380 }
 0x93e   :  { %v816_v56 = vmul.f32 %v2381_v57, %v721_v24 }
 0x93f   :  { %v2267_v51 = vadd.f32 -1.0, %v814_v50 }
 0x941   :  { %v817_v3 = vmul.f32 %v2381_v57, %v2267_v51 }
 0x943   :  { %819 = vrot.lane.b32.xlu1 %v817_v3, %s2633_s26 }
 0x9b5   :  { %v820_v31 = vpop.permute.xlu1 %819 }
 0x9b6   :  { %v822_v54 = vadd.f32 %v820_v31, %v816_v56  ;;  %v3587_v56 = vsel %vm2823_vm1, %v2899_v38, %v2897_v37 }
 0x9b8   :  { %2382 = vtanh.f32 %v822_v54 }
 0x9c5   :  { %v2383_v55 = vpop.eup %2382 }
 0x9c6   :  { %v824_v62 = vmul.f32 %v2383_v55, %v2379_v30 }
 0x9c8   :  { %826 = vrot.lane.b32.xlu0 %v824_v62, %s2633_s26  ;;  %v3588_v62 = vsel %vm2833_vm2, %v2915_v45, %v2909_v44  ;;  %v1162_v44 = vld [vmem:[#allocation8 + $0x68] sm:$0xff]  ;;  %v1161_v45 = vld [vmem:[#allocation8 + $0x60] sm:$0xff] }
 0xa3a   :  { %v3052_v39 = vpop.permute.xlu0 %826 }
 0xa3b   :  { %2268 = vmatmul.mubr.msk.f32.vlgmr.msra.gmra.mxu1 %vm321_vm3, %v3052_v39 }
 0xa3c   :  { %1049 = vmatpush1.msra.mxu1 %v2709_v6  ;;  %1096 = vmatprep.mubr.f32.mxu1 %v2629_v0 }
 0xa3d   :  { %1050 = vmatprep.subr.mxu1 %v2711_v7 }
 0xa3e   :  { %1051 = vmatpush1.msra.mxu1 %v2714_v9 }
 0xa3f   :  { %1052 = vmatprep.subr.mxu1 %v2717_v10 }
 0xa40   :  { %1053 = vmatpush1.msra.mxu1 %v2721_v11 }
 0xa41   :  { %1054 = vmatprep.subr.mxu1 %v2726_v12 }
 0xa42   :  { %1055 = vmatpush1.msra.mxu1 %v2730_v13 }
 0xa43   :  { %1056 = vmatprep.subr.mxu1 %v2733_v14 }
 0xa44   :  { %1057 = vmatpush1.msra.mxu1 %v2736_v15 }
 0xa45   :  { %1058 = vmatprep.subr.mxu1 %v2740_v16 }
 0xa46   :  { %1059 = vmatpush1.msra.mxu1 %v2744_v17 }
 0xa47   :  { %1060 = vmatprep.subr.mxu1 %v2749_v18 }
 0xa48   :  { %1061 = vmatpush1.msra.mxu1 %v2752_v19 }
 0xa49   :  { %1062 = vmatprep.subr.mxu1 %v2756_v20 }
 0xa4a   :  { %1063 = vmatpush1.msra.mxu1 %v2760_v21 }
 0xafb   :  { %v896_v6 = vpop.f32.mrf.mxu1 }
 0xafc   :  { %v901_v7 = vadd.f32 %v896_v6, %v315_v4 }
 0xafd   :  { %v898_v9 = vpop.f32.mrf.mxu1 }
 0xafe   :  { %v2269_v10 = vmul.f32 -1.442695, %v901_v7  ;;  %v902_v11 = vadd.f32 %v898_v9, %v316_v25 }
 0xb00   :  { %v2270_v12 = vmul.f32 -1.442695, %v902_v11  ;;  %2384 = vpow2.f32 %v2269_v10 }
 0xb02   :  { %2386 = vpow2.f32 %v2270_v12 }
 0xb0d   :  { %v2385_v13 = vpop.eup %2384 }
 0xb0e   :  { %v909_v16 = vadd.f32 1.0, %v2385_v13 }
 0xb0f   :  { %v2387_v14 = vpop.eup %2386 }
 0xb10   :  { %v910_v15 = vadd.f32 1.0, %v2387_v14 }
 0xb12   :  { %2388 = vrcp.f32 %v910_v15 }
 0xb13   :  { %2390 = vrcp.f32 %v909_v16  ;;  %v1164_v16 = vld [vmem:[#allocation8 + $0x78] sm:$0xff] }
 0xb14   :  { %1233 = vmatprep.subr.mxu0 %v1164_v16 }
 0xb1f   :  { %v2389_v17 = vpop.eup %2388 }
 0xb20   :  { %v915_v18 = vmul.f32 2.0, %v2389_v17  ;;  %v2391_v20 = vpop.eup %2390 }
 0xb21   :  { %v917_v59 = vmul.f32 %v2391_v20, %v822_v54 }
 0xb22   :  { %v2271_v19 = vadd.f32 -1.0, %v915_v18  ;;  %v1160_v18 = vld [vmem:[#allocation8 + $0x58] sm:$0xff] }
 0xb24   :  { %v918_v21 = vmul.f32 %v2391_v20, %v2271_v19  ;;  %v1159_v19 = vld [vmem:[#allocation8 + $0x50] sm:$0xff]  ;;  %v1158_v20 = vld [vmem:[#allocation8 + $0x48] sm:$0xff] }
 0xb26   :  { %920 = vrot.lane.b32.xlu1 %v918_v21, %s2633_s26  ;;  %v1157_v21 = vld [vmem:[#allocation8 + $0x40] sm:$0xff] }
 0xb98   :  { %v921_v60 = vpop.permute.xlu1 %920 }
 0xb99   :  { %v923_v1 = vadd.f32 %v921_v60, %v917_v59  ;;  %v1156_v59 = vld [vmem:[#allocation8 + $0x38] sm:$0xff]  ;;  %v1155_v60 = vld [vmem:[#allocation8 + $0x30] sm:$0xff] }
 0xb9b   :  { %2392 = vtanh.f32 %v923_v1 }
 0xba8   :  { %v2393_v2 = vpop.eup %2392 }
 0xba9   :  { %v925_v4 = vmul.f32 %v2393_v2, %v2389_v17  ;;  %v1163_v17 = vld [vmem:[#allocation8 + $0x70] sm:$0xff]  ;;  %v1153_v2 = vld [vmem:[#allocation8 + $0x20] sm:$0xff] }
 0xbab   :  { %927 = vrot.lane.b32.xlu0 %v925_v4, %s2633_s26  ;;  %v1152_v4 = vld [vmem:[#allocation8 + $0x18] sm:$0xff] }
 0xc1d   :  { %v3084_v25 = vpop.permute.xlu0 %927 }
 0xc1e   :  { %2272 = vmatmul.mubr.msk.f32.vlgmr.msra.gmra.mxu0 %vm321_vm3, %v3084_v25 }
 0xc1f   :  { %1281 = vmatprep.mubr.f32.mxu0 %v2629_v0  ;;  %1234 = vmatpush1.msra.mxu0 %v1163_v17 }
 0xc20   :  { %1235 = vmatprep.subr.mxu0 %v1162_v44 }
 0xc21   :  { %1236 = vmatpush1.msra.mxu0 %v1161_v45 }
 0xc22   :  { %1237 = vmatprep.subr.mxu0 %v1160_v18 }
 0xc23   :  { %1238 = vmatpush1.msra.mxu0 %v1159_v19 }
 0xc24   :  { %1239 = vmatprep.subr.mxu0 %v1158_v20 }
 0xc25   :  { %1240 = vmatpush1.msra.mxu0 %v1157_v21 }
 0xc26   :  { %1241 = vmatprep.subr.mxu0 %v1156_v59 }
 0xc27   :  { %1242 = vmatpush1.msra.mxu0 %v1155_v60 }
 0xcde   :  { %v997_v34 = vpop.f32.mrf.mxu0 }
 0xcdf   :  { %v1002_v24 = vadd.f32 %v997_v34, %v3585_v32  ;;  %v1151_v34 = vld [vmem:[#allocation8 + $0x10] sm:$0xff]  ;;  %v1150_v32 = vld [vmem:[#allocation8 + $0x8] sm:$0xff] }
 0xce0   :  { %v999_v61 = vpop.f32.mrf.mxu0 }
 0xce1   :  { %v2273_v46 = vmul.f32 -1.442695, %v1002_v24  ;;  %v1003_v49 = vadd.f32 %v999_v61, %v3586_v48  ;;  %v1149_v48 = vld [vmem:[#allocation8] sm:$0xff] }
 0xce3   :  { %v2274_v8 = vmul.f32 -1.442695, %v1003_v49  ;;  %2394 = vpow2.f32 %v2273_v46 }
 0xce5   :  { %2396 = vpow2.f32 %v2274_v8 }
 0xcf0   :  { %v2395_v26 = vpop.eup %2394 }
 0xcf1   :  { %v1010_v40 = vadd.f32 1.0, %v2395_v26  ;;  %v3118_v26 = vld [vmem:[#allocation10 + $0x78] sm:$0xff] }
 0xcf2   :  { %v2397_v36 = vpop.eup %2396  ;;  %1362 = vmatprep.subr.mxu1 %v3118_v26 }
 0xcf3   :  { %v1011_v42 = vadd.f32 1.0, %v2397_v36  ;;  %v3120_v36 = vld [vmem:[#allocation10 + $0x70] sm:$0xff] }
 0xcf5   :  { %2398 = vrcp.f32 %v1011_v42  ;;  %v3123_v42 = vld [vmem:[#allocation10 + $0x68] sm:$0xff] }
 0xcf6   :  { %2400 = vrcp.f32 %v1010_v40  ;;  %v3128_v40 = vld [vmem:[#allocation10 + $0x60] sm:$0xff] }
 0xd02   :  { %v2399_v5 = vpop.eup %2398 }
 0xd03   :  { %v1016_v22 = vmul.f32 2.0, %v2399_v5  ;;  %v2401_v29 = vpop.eup %2400 }
 0xd04   :  { %v1018_v30 = vmul.f32 %v2401_v29, %v923_v1  ;;  %v1154_v1 = vld [vmem:[#allocation8 + $0x28] sm:$0xff] }
 0xd05   :  { %v2275_v23 = vadd.f32 -1.0, %v1016_v22  ;;  %1243 = vmatprep.subr.mxu0 %v1154_v1  ;;  %v3133_v22 = vld [vmem:[#allocation10 + $0x50] sm:$0xff] }
 0xd06   :  { %1244 = vmatpush1.msra.mxu0 %v1153_v2 }
 0xd07   :  { %v1019_v53 = vmul.f32 %v2401_v29, %v2275_v23  ;;  %1245 = vmatprep.subr.mxu0 %v1152_v4  ;;  %v3136_v23 = vld [vmem:[#allocation10 + $0x48] sm:$0xff]  ;;  %v3140_v29 = vld [vmem:[#allocation10 + $0x40] sm:$0xff] }
 0xd08   :  { %1246 = vmatpush1.msra.mxu0 %v1151_v34 }
 0xd09   :  { %1021 = vrot.lane.b32.xlu1 %v1019_v53, %s2633_s26  ;;  %1247 = vmatprep.subr.mxu0 %v1150_v32  ;;  %v3143_v53 = vld [vmem:[#allocation10 + $0x38] sm:$0xff] }
 0xd0a   :  { %1248 = vmatpush1.msra.mxu0 %v1149_v48 }
 0xd0b   :  { %1564 = vmatprep.subr.mxu0 %v3118_v26 }
 0xd7b   :  { %v1022_v50 = vpop.permute.xlu1 %1021 }
 0xd7c   :  { %v1024_v27 = vadd.f32 %v1022_v50, %v1018_v30  ;;  %v3145_v30 = vld [vmem:[#allocation10 + $0x30] sm:$0xff]  ;;  %v3148_v50 = vld [vmem:[#allocation10 + $0x28] sm:$0xff] }
 0xd7e   :  { %2402 = vtanh.f32 %v1024_v27 }
 0xd8b   :  { %v2403_v28 = vpop.eup %2402 }
 0xd8c   :  { %v1026_v51 = vmul.f32 %v2403_v28, %v2399_v5  ;;  %v3131_v5 = vld [vmem:[#allocation10 + $0x58] sm:$0xff] }
 0xd8d   :  { %v3155_v28 = vld [vmem:[#allocation10 + $0x18] sm:$0xff] }
 0xd8e   :  { %1028 = vrot.lane.b32.xlu0 %v1026_v51, %s2633_s26  ;;  %v3157_v51 = vld [vmem:[#allocation10 + $0x10] sm:$0xff] }
 0xe00   :  { %v3101_v57 = vpop.permute.xlu0 %1028 }
 0xe01   :  { %2276 = vmatmul.mubr.msk.f32.vlgmr.msra.gmra.mxu1 %vm321_vm3, %v3101_v57 }
 0xe02   :  { %1410 = vmatprep.mubr.f32.mxu1 %v2629_v0  ;;  %1363 = vmatpush1.msra.mxu1 %v3120_v36 }
 0xe03   :  { %1364 = vmatprep.subr.mxu1 %v3123_v42 }
 0xe04   :  { %1365 = vmatpush1.msra.mxu1 %v3128_v40 }
 0xe05   :  { %1366 = vmatprep.subr.mxu1 %v3131_v5 }
 0xe06   :  { %1367 = vmatpush1.msra.mxu1 %v3133_v22 }
 0xe07   :  { %1368 = vmatprep.subr.mxu1 %v3136_v23 }
 0xe08   :  { %1369 = vmatpush1.msra.mxu1 %v3140_v29 }
 0xe09   :  { %1370 = vmatprep.subr.mxu1 %v3143_v53 }
 0xe0a   :  { %1371 = vmatpush1.msra.mxu1 %v3145_v30 }
 0xe0b   :  { %1372 = vmatprep.subr.mxu1 %v3148_v50 }
 0xec1   :  { %v1098_v3 = vpop.f32.mrf.mxu1 }
 0xec2   :  { %v1103_v31 = vadd.f32 %v1098_v3, %v3587_v56  ;;  %v3160_v3 = vld [vmem:[#allocation10 + $0x8] sm:$0xff]  ;;  %v3164_v56 = vld [vmem:[#allocation10] sm:$0xff] }
 0xec3   :  { %v1100_v54 = vpop.f32.mrf.mxu1 }
 0xec4   :  { %v2277_v55 = vmul.f32 -1.442695, %v1103_v31  ;;  %v1104_v6 = vadd.f32 %v1100_v54, %v3588_v62  ;;  %v1141_v62 = vsel %vm122_vm4, %v2987_v58, %v3084_v25 }
 0xec6   :  { %v2278_v7 = vmul.f32 -1.442695, %v1104_v6  ;;  %2404 = vpow2.f32 %v2277_v55  ;;  %v1138_v55 = vsel %vm122_vm4, %v2954_v41, %v3101_v57  ;;  %v1144_v6 = vsel %vm122_vm4, %v3020_v43, %v3052_v39 }
 0xec8   :  { %2406 = vpow2.f32 %v2278_v7  ;;  %v1145_v7 = vsel %vm122_vm4, %v3052_v39, %v3020_v43  ;;  %v1147_v43 = vsel %vm122_vm4, %v3101_v57, %v2954_v41  ;;  %v3589_v41 = vsub.s32 0, %v2812_v35 }
 0xed3   :  { %v2405_v9 = vpop.eup %2404 }
 0xed4   :  { %v1111_v12 = vadd.f32 1.0, %v2405_v9  ;;  %v1146_v9 = vsel %vm122_vm4, %v3084_v25, %v2987_v58  ;;  %v1181_v58 = vld [vmem:[%s3577_s6] sm:$0x3]  ;;  %s2636_s6 = smov [#allocation11]  }
 0xed5   :  { %v2407_v10 = vpop.eup %2406  ;;  %v1186_v57 = vrot.slane %v1181_v58, %v3589_v41  ;;  %s2230_s9 = sshll.u32 %s2636_s6, 4  ;;  %s2231_s9 = int_to_ptr.vmem [resolvable:$true] %s2230_s9 }
 0xed6   :  { %v1112_v11 = vadd.f32 1.0, %v2407_v10  ;;  %s2594_s10 = scalar_lea.vmem %s2231_s9, 256  ;;  %p2599_p12 = scmp.lt.s32.totalorder %s2231_s9, %s2231_s9 }
 0xed7   :  { %p2595_p11 = scmp.ne.s32.totalorder %s2231_s9, %s2594_s10  ;;  %p2600_p13 = scmp.lt.s32.totalorder %s2594_s10, %s2594_s10 }
 0xed8   :  { %2408 = vrcp.f32 %v1112_v11 }
 0xed9   :  { %2410 = vrcp.f32 %v1111_v12  ;;  %v3590_v12 = vsub.s32 1, %v2812_v35  ;;  %p2601_p0 = por %p2600_p13, %p2599_p12 }
 0xedb   :  { %p2602_p1 = pnand %p2601_p0, %p2595_p11 }
 0xee5   :  { %v2409_v13 = vpop.eup %2408 }
 0xee6   :  { %v1117_v37 = vmul.f32 2.0, %v2409_v13  ;;  %v2411_v14 = vpop.eup %2410 }
 0xee7   :  { %v1119_v24 = vmul.f32 %v2411_v14, %v1024_v27  ;;  %v3152_v27 = vld [vmem:[#allocation10 + $0x20] sm:$0xff] }
 0xee8   :  { %v2279_v38 = vadd.f32 -1.0, %v1117_v37  ;;  %1373 = vmatpush1.msra.mxu1 %v3152_v27 }
 0xee9   :  { %1374 = vmatprep.subr.mxu1 %v3155_v28 }
 0xeea   :  { %v1120_v15 = vmul.f32 %v2411_v14, %v2279_v38  ;;  %1375 = vmatpush1.msra.mxu1 %v3157_v51 }
 0xeeb   :  { %1376 = vmatprep.subr.mxu1 %v3160_v3 }
 0xeec   :  { %1122 = vrot.lane.b32.xlu1 %v1120_v15, %s2633_s26  ;;  %1377 = vmatpush1.msra.mxu1 %v3164_v56 }
 0xeed   :  { %1411 = vmatmul.mubr.f32.vlgmr.msra.gmra.mxu1 %v2629_v0  ;;  %1463 = vmatprep.subr.mxu1 %v3118_v26 }
 0xeee   :  { %1464 = vmatpush1.msra.mxu1 %v3120_v36  ;;  %1511 = vmatprep.mubr.f32.mxu1 %v2629_v0 }
 0xeef   :  { %1465 = vmatprep.subr.mxu1 %v3123_v42 }
 0xef0   :  { %1466 = vmatpush1.msra.mxu1 %v3128_v40 }
 0xef1   :  { %1467 = vmatprep.subr.mxu1 %v3131_v5 }
 0xef2   :  { %1468 = vmatpush1.msra.mxu1 %v3133_v22 }
 0xef3   :  { %1469 = vmatprep.subr.mxu1 %v3136_v23 }
 0xef4   :  { %1470 = vmatpush1.msra.mxu1 %v3140_v29 }
 0xef5   :  { %1471 = vmatprep.subr.mxu1 %v3143_v53 }
 0xef6   :  { %1472 = vmatpush1.msra.mxu1 %v3145_v30 }
 0xef7   :  { %1473 = vmatprep.subr.mxu1 %v3148_v50 }
 0xef8   :  { %1474 = vmatpush1.msra.mxu1 %v3152_v27 }
 0xef9   :  { %1475 = vmatprep.subr.mxu1 %v3155_v28 }
 0xefa   :  { %1476 = vmatpush1.msra.mxu1 %v3157_v51 }
 0xefb   :  { %1477 = vmatprep.subr.mxu1 %v3160_v3 }
 0xefc   :  { %1478 = vmatpush1.msra.mxu1 %v3164_v56 }
 0xefd   :  { %1665 = vmatprep.subr.mxu1 %v3118_v26 }
 0xf5e   :  { %v1123_v61 = vpop.permute.xlu1 %1122 }
 0xf5f   :  { %v1125_v46 = vadd.f32 %v1123_v61, %v1119_v24 }
 0xf61   :  { %2412 = vtanh.f32 %v1125_v46 }
 0xf6e   :  { %v2413_v49 = vpop.eup %2412 }
 0xf6f   :  { %v1127_v8 = vmul.f32 %v2413_v49, %v2409_v13  ;;  %v1190_v13 = vrot.slane %v1181_v58, %v3590_v12 }
 0xf71   :  { %1132 = vrot.lane.b32.xlu0 %v1127_v8, %s2633_s26 }
 0xfe3   :  { %v1133_v31 = vpop.permute.xlu0 %1132 }
 0xfe4   :  { %v1135_v54 = vsel %vm122_vm4, %v2931_v63, %v1133_v31  ;;  %v1148_v39 = vsel %vm122_vm4, %v1133_v31, %v2931_v63 }
 0xfe5   :  { %2280 = vmatmul.mubr.msk.f32.vlgmr.msra.gmra.mxu0 %vm321_vm3, %v1135_v54 }
 0xfe6   :  { %1287 = vmatprep.mubr.f32.mxu0 %v2629_v0  ;;  %1565 = vmatpush1.msra.mxu0 %v3120_v36 }
 0xfe7   :  { %1566 = vmatprep.subr.mxu0 %v3123_v42 }
 0xfe8   :  { %1567 = vmatpush1.msra.mxu0 %v3128_v40 }
 0xfe9   :  { %2281 = vmatmul.mubr.msk.f32.gmra.mxu0 %vm321_vm3, %v1138_v55  ;;  %1568 = vmatprep.subr.mxu0 %v3131_v5 }
 0xfea   :  { %1293 = vmatprep.mubr.f32.mxu0 %v2629_v0  ;;  %1569 = vmatpush1.msra.mxu0 %v3133_v22 }
 0xfeb   :  { %1570 = vmatprep.subr.mxu0 %v3136_v23 }
 0xfec   :  { %1571 = vmatpush1.msra.mxu0 %v3140_v29 }
 0xfed   :  { %2282 = vmatmul.mubr.msk.f32.gmra.mxu0 %vm321_vm3, %v1141_v62  ;;  %1572 = vmatprep.subr.mxu0 %v3143_v53 }
 0xfee   :  { %1299 = vmatprep.mubr.f32.mxu0 %v2629_v0  ;;  %1573 = vmatpush1.msra.mxu0 %v3145_v30 }
 0xfef   :  { %1574 = vmatprep.subr.mxu0 %v3148_v50 }
 0xff0   :  { %1575 = vmatpush1.msra.mxu0 %v3152_v27 }
 0xff1   :  { %2283 = vmatmul.mubr.msk.f32.gmra.mxu0 %vm321_vm3, %v1144_v6  ;;  %1576 = vmatprep.subr.mxu0 %v3155_v28 }
 0xff2   :  { %1305 = vmatprep.mubr.f32.mxu0 %v2629_v0  ;;  %1577 = vmatpush1.msra.mxu0 %v3157_v51 }
 0xff3   :  { %1578 = vmatprep.subr.mxu0 %v3160_v3 }
 0xff4   :  { %1579 = vmatpush1.msra.mxu0 %v3164_v56 }
 0xff5   :  { %2284 = vmatmul.mubr.msk.f32.gmra.mxu0 %vm321_vm3, %v1145_v7  ;;  %1766 = vmatprep.subr.mxu0 %v3118_v26 }
 0xff6   :  { %1311 = vmatprep.mubr.f32.mxu0 %v2629_v0 }
 0xff9   :  { %2285 = vmatmul.mubr.msk.f32.gmra.mxu0 %vm321_vm3, %v1146_v9 }
 0xffa   :  { %1317 = vmatprep.mubr.f32.mxu0 %v2629_v0 }
 0xffd   :  { %2286 = vmatmul.mubr.msk.f32.gmra.mxu0 %vm321_vm3, %v1147_v43 }
 0xffe   :  { %1323 = vmatprep.mubr.f32.mxu0 %v2629_v0 }
0x1001   :  { %2287 = vmatmul.mubr.msk.f32.gmra.mxu0 %vm321_vm3, %v1148_v39  ;;  %v1412_v39 = vpop.f32.mrf.mxu1 }
0x1002   :  { %1612 = vmatprep.mubr.f32.mxu0 %v2629_v0 }
0x10a5   :  { %v1283_v25 = vpop.f32.mrf.mxu0 }
0x10a6   :  { %v3320_v9 = vadd.f32 %v1283_v25, %v1186_v57 }
0x10a7   :  { %v1285_v10 = vpop.f32.mrf.mxu0 }
0x10a8   :  { %v3332_v12 = vadd.f32 %v1285_v10, %v1190_v13  ;;  %v1414_v10 = vpop.f32.mrf.mxu1 }
0x10a9   :  { %v1289_v11 = vpop.f32.mrf.mxu0 }
0x10aa   :  { %v3256_v37 = vadd.f32 %v1289_v11, %v1186_v57 }
0x10ab   :  { %v1291_v33 = vpop.f32.mrf.mxu0 }
0x10ac   :  { %v3258_v63 = vadd.f32 %v1291_v33, %v1190_v13 }
0x10ad   :  { %v1295_v38 = vpop.f32.mrf.mxu0 }
0x10ae   :  { %v3260_v14 = vadd.f32 %v1295_v38, %v1186_v57 }
0x10af   :  { %v1297_v15 = vpop.f32.mrf.mxu0 }
0x10b0   :  { %v3262_v16 = vadd.f32 %v1297_v15, %v1190_v13 }
0x10b1   :  { %v1301_v17 = vpop.f32.mrf.mxu0 }
0x10b2   :  { %v3264_v44 = vadd.f32 %v1301_v17, %v1186_v57 }
0x10b3   :  { %v1303_v45 = vpop.f32.mrf.mxu0 }
0x10b4   :  { %v3266_v18 = vadd.f32 %v1303_v45, %v1190_v13 }
0x10b5   :  { %v1307_v19 = vpop.f32.mrf.mxu0 }
0x10b6   :  { %v3268_v35 = vadd.f32 %v1307_v19, %v1186_v57 }
0x10b7   :  { %v1309_v20 = vpop.f32.mrf.mxu0 }
0x10b8   :  { %v3270_v21 = vadd.f32 %v1309_v20, %v1190_v13  ;;  %v1336_v59 = vsel %vm2823_vm1, %v3264_v44, %v3268_v35  ;;  %v1338_v60 = vsel %vm2823_vm1, %v3268_v35, %v3264_v44 }
0x10b9   :  { %v1313_v1 = vpop.f32.mrf.mxu0 }
0x10ba   :  { %v3280_v2 = vadd.f32 %v1313_v1, %v1186_v57  ;;  %v1337_v4 = vsel %vm2833_vm2, %v3266_v18, %v3270_v21  ;;  %v1339_v34 = vsel %vm2833_vm2, %v3270_v21, %v3266_v18 }
0x10bb   :  { %v1315_v32 = vpop.f32.mrf.mxu0 }
0x10bc   :  { %v3290_v24 = vadd.f32 %v1315_v32, %v1190_v13  ;;  %v1334_v61 = vsel %vm2823_vm1, %v3260_v14, %v3280_v2  ;;  %v1340_v46 = vsel %vm2823_vm1, %v3280_v2, %v3260_v14 }
0x10bd   :  { %v1319_v48 = vpop.f32.mrf.mxu0 }
0x10be   :  { %v3300_v49 = vadd.f32 %v1319_v48, %v1186_v57  ;;  %v1335_v8 = vsel %vm2833_vm2, %v3262_v16, %v3290_v24  ;;  %v1341_v31 = vsel %vm2833_vm2, %v3290_v24, %v3262_v16 }
0x10bf   :  { %v1321_v54 = vpop.f32.mrf.mxu0 }
0x10c0   :  { %v3310_v55 = vadd.f32 %v1321_v54, %v1190_v13  ;;  %v1332_v62 = vsel %vm2823_vm1, %v3256_v37, %v3300_v49  ;;  %v1342_v6 = vsel %vm2823_vm1, %v3300_v49, %v3256_v37 }
0x10c1   :  { %v1325_v7 = vpop.f32.mrf.mxu0 }
0x10c2   :  { %v3322_v43 = vadd.f32 %v1325_v7, %v1186_v57  ;;  %v1333_v58 = vsel %vm2833_vm2, %v3258_v63, %v3310_v55  ;;  %v1343_v41 = vsel %vm2833_vm2, %v3310_v55, %v3258_v63 }
0x10c3   :  { %v1327_v11 = vpop.f32.mrf.mxu0 }
0x10c4   :  { %v1330_v25 = vsel %vm2823_vm1, %v3320_v9, %v3322_v43  ;;  %v3338_v57 = vadd.f32 %v1327_v11, %v1190_v13 }
0x10c5   :  { %v1417_v38 = vadd.f32 %v1412_v39, %v1330_v25 }
0x10c6   :  { %v1331_v15 = vsel %vm2833_vm2, %v3332_v12, %v3338_v57 }
0x10c7   :  { %v2288_v45 = vmul.f32 -1.442695, %v1417_v38  ;;  %v1418_v13 = vadd.f32 %v1414_v10, %v1331_v15 }
0x10c9   :  { %v2289_v19 = vmul.f32 -1.442695, %v1418_v13  ;;  %2414 = vpow2.f32 %v2288_v45 }
0x10cb   :  { %2416 = vpow2.f32 %v2289_v19 }
0x10d6   :  { %v2415_v20 = vpop.eup %2414 }
0x10d7   :  { %v1425_v48 = vadd.f32 1.0, %v2415_v20 }
0x10d8   :  { %v2417_v1 = vpop.eup %2416 }
0x10d9   :  { %v1426_v32 = vadd.f32 1.0, %v2417_v1 }
0x10db   :  { %2418 = vrcp.f32 %v1426_v32 }
0x10dc   :  { %2420 = vrcp.f32 %v1425_v48 }
0x10e8   :  { %v2419_v54 = vpop.eup %2418 }
0x10e9   :  { %v1431_v7 = vmul.f32 2.0, %v2419_v54  ;;  %v2421_v11 = vpop.eup %2420 }
0x10ea   :  { %v1433_v33 = vmul.f32 0.0, %v2421_v11 }
0x10eb   :  { %v2290_v39 = vadd.f32 -1.0, %v1431_v7 }
0x10ed   :  { %v1434_v25 = vmul.f32 %v2421_v11, %v2290_v39 }
0x10ef   :  { %1436 = vrot.lane.b32.xlu1 %v1434_v25, %s2633_s26 }
0x1161   :  { %v1437_v17 = vpop.permute.xlu1 %1436 }
0x1162   :  { %v1439_v38 = vadd.f32 %v1437_v17, %v1433_v33 }
0x1164   :  { %2422 = vtanh.f32 %v1439_v38 }
0x1171   :  { %v2423_v15 = vpop.eup %2422 }
0x1172   :  { %v3353_v10 = vmul.f32 %v2423_v15, %v2419_v54 }
0x1174   :  { %1443 = vrot.lane.b32.xlu0 %v3353_v10, %s2633_s26 }
0x11e6   :  { %v1444_v45 = vpop.permute.xlu0 %1443 }
0x11e7   :  { %2291 = vmatmul.mubr.msk.f32.vlgmr.msra.gmra.mxu1 %vm321_vm3, %v1444_v45 }
0x11e8   :  { %1666 = vmatpush1.msra.mxu1 %v3120_v36  ;;  %1713 = vmatprep.mubr.f32.mxu1 %v2629_v0 }
0x11e9   :  { %1667 = vmatprep.subr.mxu1 %v3123_v42 }
0x11ea   :  { %1668 = vmatpush1.msra.mxu1 %v3128_v40 }
0x11eb   :  { %1669 = vmatprep.subr.mxu1 %v3131_v5 }
0x11ec   :  { %1670 = vmatpush1.msra.mxu1 %v3133_v22 }
0x11ed   :  { %1671 = vmatprep.subr.mxu1 %v3136_v23 }
0x11ee   :  { %1672 = vmatpush1.msra.mxu1 %v3140_v29 }
0x11ef   :  { %1673 = vmatprep.subr.mxu1 %v3143_v53 }
0x11f0   :  { %1674 = vmatpush1.msra.mxu1 %v3145_v30 }
0x11f1   :  { %1675 = vmatprep.subr.mxu1 %v3148_v50 }
0x11f2   :  { %1676 = vmatpush1.msra.mxu1 %v3152_v27 }
0x11f3   :  { %1677 = vmatprep.subr.mxu1 %v3155_v28 }
0x11f4   :  { %1678 = vmatpush1.msra.mxu1 %v3157_v51 }
0x11f5   :  { %1679 = vmatprep.subr.mxu1 %v3160_v3 }
0x11f6   :  { %1680 = vmatpush1.msra.mxu1 %v3164_v56 }
0x11f7   :  { %1867 = vmatprep.subr.mxu1 %v3118_v26 }
0x12a7   :  { %v1513_v33 = vpop.f32.mrf.mxu1 }
0x12a8   :  { %v1518_v17 = vadd.f32 %v1513_v33, %v1332_v62 }
0x12a9   :  { %v1515_v13 = vpop.f32.mrf.mxu1 }
0x12aa   :  { %v2292_v19 = vmul.f32 -1.442695, %v1518_v17  ;;  %v1519_v20 = vadd.f32 %v1515_v13, %v1333_v58 }
0x12ac   :  { %v2293_v1 = vmul.f32 -1.442695, %v1519_v20  ;;  %2424 = vpow2.f32 %v2292_v19 }
0x12ae   :  { %2426 = vpow2.f32 %v2293_v1 }
0x12b9   :  { %v2425_v32 = vpop.eup %2424 }
0x12ba   :  { %v1526_v7 = vadd.f32 1.0, %v2425_v32 }
0x12bb   :  { %v2427_v48 = vpop.eup %2426 }
0x12bc   :  { %v1527_v54 = vadd.f32 1.0, %v2427_v48 }
0x12be   :  { %2428 = vrcp.f32 %v1527_v54 }
0x12bf   :  { %2430 = vrcp.f32 %v1526_v7 }
0x12cb   :  { %v2429_v39 = vpop.eup %2428 }
0x12cc   :  { %v1532_v11 = vmul.f32 2.0, %v2429_v39  ;;  %v2431_v15 = vpop.eup %2430 }
0x12cd   :  { %v1534_v62 = vmul.f32 %v2431_v15, %v1439_v38 }
0x12ce   :  { %v2294_v25 = vadd.f32 -1.0, %v1532_v11 }
0x12d0   :  { %v1535_v45 = vmul.f32 %v2431_v15, %v2294_v25 }
0x12d2   :  { %1537 = vrot.lane.b32.xlu1 %v1535_v45, %s2633_s26 }
0x1344   :  { %v1538_v33 = vpop.permute.xlu1 %1537 }
0x1345   :  { %v1540_v17 = vadd.f32 %v1538_v33, %v1534_v62 }
0x1347   :  { %2432 = vtanh.f32 %v1540_v17 }
0x1354   :  { %v2433_v58 = vpop.eup %2432 }
0x1355   :  { %v3376_v13 = vmul.f32 %v2433_v58, %v2429_v39 }
0x1357   :  { %1544 = vrot.lane.b32.xlu0 %v3376_v13, %s2633_s26 }
0x13c9   :  { %v1545_v19 = vpop.permute.xlu0 %1544 }
0x13ca   :  { %2295 = vmatmul.mubr.msk.f32.vlgmr.msra.gmra.mxu0 %vm321_vm3, %v1545_v19 }
0x13cb   :  { %1767 = vmatpush1.msra.mxu0 %v3120_v36  ;;  %1814 = vmatprep.mubr.f32.mxu0 %v2629_v0 }
0x13cc   :  { %1768 = vmatprep.subr.mxu0 %v3123_v42 }
0x13cd   :  { %1769 = vmatpush1.msra.mxu0 %v3128_v40 }
0x13ce   :  { %1770 = vmatprep.subr.mxu0 %v3131_v5 }
0x13cf   :  { %1771 = vmatpush1.msra.mxu0 %v3133_v22 }
0x13d0   :  { %1772 = vmatprep.subr.mxu0 %v3136_v23 }
0x13d1   :  { %1773 = vmatpush1.msra.mxu0 %v3140_v29 }
0x13d2   :  { %1774 = vmatprep.subr.mxu0 %v3143_v53 }
0x13d3   :  { %1775 = vmatpush1.msra.mxu0 %v3145_v30 }
0x13d4   :  { %1776 = vmatprep.subr.mxu0 %v3148_v50 }
0x13d5   :  { %1777 = vmatpush1.msra.mxu0 %v3152_v27 }
0x13d6   :  { %1778 = vmatprep.subr.mxu0 %v3155_v28 }
0x13d7   :  { %1779 = vmatpush1.msra.mxu0 %v3157_v51 }
0x13d8   :  { %1780 = vmatprep.subr.mxu0 %v3160_v3 }
0x13d9   :  { %1781 = vmatpush1.msra.mxu0 %v3164_v56 }
0x13da   :  { %1968 = vmatprep.subr.mxu0 %v3118_v26 }
0x148a   :  { %v1614_v38 = vpop.f32.mrf.mxu0 }
0x148b   :  { %v1619_v20 = vadd.f32 %v1614_v38, %v1334_v61 }
0x148c   :  { %v1616_v1 = vpop.f32.mrf.mxu0 }
0x148d   :  { %v2296_v32 = vmul.f32 -1.442695, %v1619_v20  ;;  %v1620_v48 = vadd.f32 %v1616_v1, %v1335_v8 }
0x148f   :  { %v2297_v54 = vmul.f32 -1.442695, %v1620_v48  ;;  %2434 = vpow2.f32 %v2296_v32 }
0x1491   :  { %2436 = vpow2.f32 %v2297_v54 }
0x149c   :  { %v2435_v7 = vpop.eup %2434 }
0x149d   :  { %v1627_v25 = vadd.f32 1.0, %v2435_v7 }
0x149e   :  { %v2437_v39 = vpop.eup %2436 }
0x149f   :  { %v1628_v11 = vadd.f32 1.0, %v2437_v39 }
0x14a1   :  { %2438 = vrcp.f32 %v1628_v11 }
0x14a2   :  { %2440 = vrcp.f32 %v1627_v25 }
0x14ae   :  { %v2439_v15 = vpop.eup %2438 }
0x14af   :  { %v1633_v45 = vmul.f32 2.0, %v2439_v15  ;;  %v2441_v62 = vpop.eup %2440 }
0x14b0   :  { %v1635_v58 = vmul.f32 %v2441_v62, %v1540_v17 }
0x14b1   :  { %v2298_v61 = vadd.f32 -1.0, %v1633_v45 }
0x14b3   :  { %v1636_v33 = vmul.f32 %v2441_v62, %v2298_v61 }
0x14b5   :  { %1638 = vrot.lane.b32.xlu1 %v1636_v33, %s2633_s26 }
0x1527   :  { %v1639_v19 = vpop.permute.xlu1 %1638 }
0x1528   :  { %v1641_v38 = vadd.f32 %v1639_v19, %v1635_v58 }
0x152a   :  { %2442 = vtanh.f32 %v1641_v38 }
0x1537   :  { %v2443_v8 = vpop.eup %2442 }
0x1538   :  { %v3409_v20 = vmul.f32 %v2443_v8, %v2439_v15 }
0x153a   :  { %1645 = vrot.lane.b32.xlu0 %v3409_v20, %s2633_s26 }
0x15ac   :  { %v1646_v1 = vpop.permute.xlu0 %1645 }
0x15ad   :  { %2299 = vmatmul.mubr.msk.f32.vlgmr.msra.gmra.mxu1 %vm321_vm3, %v1646_v1 }
0x15ae   :  { %1868 = vmatpush1.msra.mxu1 %v3120_v36  ;;  %1915 = vmatprep.mubr.f32.mxu1 %v2629_v0 }
0x15af   :  { %1869 = vmatprep.subr.mxu1 %v3123_v42 }
0x15b0   :  { %1870 = vmatpush1.msra.mxu1 %v3128_v40 }
0x15b1   :  { %1871 = vmatprep.subr.mxu1 %v3131_v5 }
0x15b2   :  { %1872 = vmatpush1.msra.mxu1 %v3133_v22 }
0x15b3   :  { %1873 = vmatprep.subr.mxu1 %v3136_v23 }
0x15b4   :  { %1874 = vmatpush1.msra.mxu1 %v3140_v29 }
0x15b5   :  { %1875 = vmatprep.subr.mxu1 %v3143_v53 }
0x15b6   :  { %1876 = vmatpush1.msra.mxu1 %v3145_v30 }
0x15b7   :  { %1877 = vmatprep.subr.mxu1 %v3148_v50 }
0x15b8   :  { %1878 = vmatpush1.msra.mxu1 %v3152_v27 }
0x15b9   :  { %1879 = vmatprep.subr.mxu1 %v3155_v28 }
0x15ba   :  { %1880 = vmatpush1.msra.mxu1 %v3157_v51 }
0x15bb   :  { %1881 = vmatprep.subr.mxu1 %v3160_v3 }
0x15bc   :  { %1882 = vmatpush1.msra.mxu1 %v3164_v56 }
0x15bd   :  { %2069 = vmatprep.subr.mxu1 %v3118_v26 }
0x166d   :  { %v1715_v17 = vpop.f32.mrf.mxu1 }
0x166e   :  { %v1720_v32 = vadd.f32 %v1715_v17, %v1336_v59 }
0x166f   :  { %v1717_v48 = vpop.f32.mrf.mxu1 }
0x1670   :  { %v2300_v54 = vmul.f32 -1.442695, %v1720_v32  ;;  %v1721_v7 = vadd.f32 %v1717_v48, %v1337_v4 }
0x1672   :  { %v2301_v39 = vmul.f32 -1.442695, %v1721_v7  ;;  %2444 = vpow2.f32 %v2300_v54 }
0x1674   :  { %2446 = vpow2.f32 %v2301_v39 }
0x167f   :  { %v2445_v11 = vpop.eup %2444 }
0x1680   :  { %v1728_v15 = vadd.f32 1.0, %v2445_v11 }
0x1681   :  { %v2447_v26 = vpop.eup %2446 }
0x1682   :  { %v1729_v25 = vadd.f32 1.0, %v2447_v26 }
0x1684   :  { %2448 = vrcp.f32 %v1729_v25 }
0x1685   :  { %2450 = vrcp.f32 %v1728_v15 }
0x1691   :  { %v2449_v45 = vpop.eup %2448 }
0x1692   :  { %v1734_v61 = vmul.f32 2.0, %v2449_v45  ;;  %v2451_v62 = vpop.eup %2450 }
0x1693   :  { %v1736_v58 = vmul.f32 %v2451_v62, %v1641_v38 }
0x1694   :  { %v2302_v59 = vadd.f32 -1.0, %v1734_v61 }
0x1696   :  { %v1737_v33 = vmul.f32 %v2451_v62, %v2302_v59 }
0x1698   :  { %1739 = vrot.lane.b32.xlu1 %v1737_v33, %s2633_s26 }
0x170a   :  { %v1740_v19 = vpop.permute.xlu1 %1739 }
0x170b   :  { %v1742_v8 = vadd.f32 %v1740_v19, %v1736_v58 }
0x170d   :  { %2452 = vtanh.f32 %v1742_v8 }
0x171a   :  { %v2453_v4 = vpop.eup %2452 }
0x171b   :  { %v3442_v1 = vmul.f32 %v2453_v4, %v2449_v45 }
0x171d   :  { %1746 = vrot.lane.b32.xlu0 %v3442_v1, %s2633_s26 }
0x178f   :  { %v1747_v17 = vpop.permute.xlu0 %1746 }
0x1790   :  { %2303 = vmatmul.mubr.msk.f32.vlgmr.msra.gmra.mxu0 %vm321_vm3, %v1747_v17 }
0x1791   :  { %1969 = vmatpush1.msra.mxu0 %v3120_v36  ;;  %2016 = vmatprep.mubr.f32.mxu0 %v2629_v0 }
0x1792   :  { %1970 = vmatprep.subr.mxu0 %v3123_v42 }
0x1793   :  { %1971 = vmatpush1.msra.mxu0 %v3128_v40 }
0x1794   :  { %1972 = vmatprep.subr.mxu0 %v3131_v5 }
0x1795   :  { %1973 = vmatpush1.msra.mxu0 %v3133_v22 }
0x1796   :  { %1974 = vmatprep.subr.mxu0 %v3136_v23 }
0x1797   :  { %1975 = vmatpush1.msra.mxu0 %v3140_v29 }
0x1798   :  { %1976 = vmatprep.subr.mxu0 %v3143_v53 }
0x1799   :  { %1977 = vmatpush1.msra.mxu0 %v3145_v30 }
0x179a   :  { %1978 = vmatprep.subr.mxu0 %v3148_v50 }
0x179b   :  { %1979 = vmatpush1.msra.mxu0 %v3152_v27 }
0x179c   :  { %1980 = vmatprep.subr.mxu0 %v3155_v28 }
0x179d   :  { %1981 = vmatpush1.msra.mxu0 %v3157_v51 }
0x179e   :  { %1982 = vmatprep.subr.mxu0 %v3160_v3 }
0x179f   :  { %1983 = vmatpush1.msra.mxu0 %v3164_v56 }
0x1850   :  { %v1816_v38 = vpop.f32.mrf.mxu0 }
0x1851   :  { %v1821_v32 = vadd.f32 %v1816_v38, %v1338_v60 }
0x1852   :  { %v1818_v48 = vpop.f32.mrf.mxu0 }
0x1853   :  { %v2304_v54 = vmul.f32 -1.442695, %v1821_v32  ;;  %v1822_v7 = vadd.f32 %v1818_v48, %v1339_v34 }
0x1855   :  { %v2305_v39 = vmul.f32 -1.442695, %v1822_v7  ;;  %2454 = vpow2.f32 %v2304_v54 }
0x1857   :  { %2456 = vpow2.f32 %v2305_v39 }
0x1862   :  { %v2455_v11 = vpop.eup %2454 }
0x1863   :  { %v1829_v15 = vadd.f32 1.0, %v2455_v11 }
0x1864   :  { %v2457_v26 = vpop.eup %2456 }
0x1865   :  { %v1830_v25 = vadd.f32 1.0, %v2457_v26 }
0x1867   :  { %2458 = vrcp.f32 %v1830_v25 }
0x1868   :  { %2460 = vrcp.f32 %v1829_v15 }
0x1874   :  { %v2459_v45 = vpop.eup %2458 }
0x1875   :  { %v1835_v44 = vmul.f32 2.0, %v2459_v45  ;;  %v2461_v60 = vpop.eup %2460 }
0x1876   :  { %v1837_v59 = vmul.f32 %v2461_v60, %v1742_v8 }
0x1877   :  { %v2306_v35 = vadd.f32 -1.0, %v1835_v44 }
0x1879   :  { %v1838_v61 = vmul.f32 %v2461_v60, %v2306_v35 }
0x187b   :  { %1840 = vrot.lane.b32.xlu1 %v1838_v61, %s2633_s26 }
0x18ed   :  { %v1841_v62 = vpop.permute.xlu1 %1840 }
0x18ee   :  { %v1843_v18 = vadd.f32 %v1841_v62, %v1837_v59 }
0x18f0   :  { %2462 = vtanh.f32 %v1843_v18 }
0x18fd   :  { %v2463_v21 = vpop.eup %2462 }
0x18fe   :  { %v3474_v34 = vmul.f32 %v2463_v21, %v2459_v45 }
0x1900   :  { %1847 = vrot.lane.b32.xlu0 %v3474_v34, %s2633_s26 }
0x1972   :  { %v1848_v33 = vpop.permute.xlu0 %1847 }
0x1973   :  { %2307 = vmatmul.mubr.msk.f32.vlgmr.msra.gmra.mxu1 %vm321_vm3, %v1848_v33 }
0x1974   :  { %2070 = vmatpush1.msra.mxu1 %v3120_v36  ;;  %2117 = vmatprep.mubr.f32.mxu1 %v2629_v0 }
0x1975   :  { %2071 = vmatprep.subr.mxu1 %v3123_v42 }
0x1976   :  { %2072 = vmatpush1.msra.mxu1 %v3128_v40 }
0x1977   :  { %2073 = vmatprep.subr.mxu1 %v3131_v5 }
0x1978   :  { %2074 = vmatpush1.msra.mxu1 %v3133_v22 }
0x1979   :  { %2075 = vmatprep.subr.mxu1 %v3136_v23 }
0x197a   :  { %2076 = vmatpush1.msra.mxu1 %v3140_v29 }
0x197b   :  { %2077 = vmatprep.subr.mxu1 %v3143_v53 }
0x197c   :  { %2078 = vmatpush1.msra.mxu1 %v3145_v30 }
0x197d   :  { %2079 = vmatprep.subr.mxu1 %v3148_v50 }
0x197e   :  { %2080 = vmatpush1.msra.mxu1 %v3152_v27 }
0x197f   :  { %2081 = vmatprep.subr.mxu1 %v3155_v28 }
0x1980   :  { %2082 = vmatpush1.msra.mxu1 %v3157_v51 }
0x1981   :  { %2083 = vmatprep.subr.mxu1 %v3160_v3 }
0x1982   :  { %2084 = vmatpush1.msra.mxu1 %v3164_v56 }
0x1a33   :  { %v1917_v0 = vpop.f32.mrf.mxu1 }
0x1a34   :  { %v1922_v36 = vadd.f32 %v1917_v0, %v1340_v46 }
0x1a35   :  { %v1919_v42 = vpop.f32.mrf.mxu1 }
0x1a36   :  { %v2308_v40 = vmul.f32 -1.442695, %v1922_v36  ;;  %v1923_v5 = vadd.f32 %v1919_v42, %v1341_v31  ;;  %v3592_v36 = vsel %vm2833_vm2, %v3338_v57, %v3332_v12 }
0x1a38   :  { %v2309_v22 = vmul.f32 -1.442695, %v1923_v5  ;;  %2464 = vpow2.f32 %v2308_v40 }
0x1a3a   :  { %2466 = vpow2.f32 %v2309_v22 }
0x1a45   :  { %v2465_v23 = vpop.eup %2464 }
0x1a46   :  { %v1930_v30 = vadd.f32 1.0, %v2465_v23 }
0x1a47   :  { %v2467_v29 = vpop.eup %2466 }
0x1a48   :  { %v1931_v53 = vadd.f32 1.0, %v2467_v29 }
0x1a4a   :  { %2468 = vrcp.f32 %v1931_v53 }
0x1a4b   :  { %2470 = vrcp.f32 %v1930_v30 }
0x1a57   :  { %v2469_v50 = vpop.eup %2468 }
0x1a58   :  { %v1936_v27 = vmul.f32 2.0, %v2469_v50  ;;  %v2471_v51 = vpop.eup %2470 }
0x1a59   :  { %v1938_v56 = vmul.f32 %v2471_v51, %v1843_v18 }
0x1a5a   :  { %v2310_v28 = vadd.f32 -1.0, %v1936_v27 }
0x1a5c   :  { %v1939_v3 = vmul.f32 %v2471_v51, %v2310_v28 }
0x1a5e   :  { %1941 = vrot.lane.b32.xlu1 %v1939_v3, %s2633_s26 }
0x1ad0   :  { %v1942_v14 = vpop.permute.xlu1 %1941 }
0x1ad1   :  { %v1944_v16 = vadd.f32 %v1942_v14, %v1938_v56 }
0x1ad3   :  { %2472 = vtanh.f32 %v1944_v16 }
0x1ae0   :  { %v2473_v2 = vpop.eup %2472 }
0x1ae1   :  { %v3506_v24 = vmul.f32 %v2473_v2, %v2469_v50 }
0x1ae3   :  { %1948 = vrot.lane.b32.xlu0 %v3506_v24, %s2633_s26 }
0x1b55   :  { %v1949_v46 = vpop.permute.xlu0 %1948 }
0x1b56   :  { %2311 = vmatmul.mubr.msk.f32.vlgmr.msra.gmra.mxu0 %vm321_vm3, %v1949_v46 }
0x1c16   :  { %v2018_v31 = vpop.f32.mrf.mxu0 }
0x1c17   :  { %v2023_v58 = vadd.f32 %v2018_v31, %v1342_v6 }
0x1c18   :  { %v2020_v19 = vpop.f32.mrf.mxu0 }
0x1c19   :  { %v2312_v8 = vmul.f32 -1.442695, %v2023_v58  ;;  %v2024_v4 = vadd.f32 %v2020_v19, %v1343_v41 }
0x1c1b   :  { %v2313_v17 = vmul.f32 -1.442695, %v2024_v4  ;;  %2474 = vpow2.f32 %v2312_v8 }
0x1c1d   :  { %2476 = vpow2.f32 %v2313_v17 }
0x1c28   :  { %v2475_v38 = vpop.eup %2474 }
0x1c29   :  { %v2031_v54 = vadd.f32 1.0, %v2475_v38 }
0x1c2a   :  { %v2477_v32 = vpop.eup %2476 }
0x1c2b   :  { %v2032_v48 = vadd.f32 1.0, %v2477_v32 }
0x1c2d   :  { %2478 = vrcp.f32 %v2032_v48 }
0x1c2e   :  { %2480 = vrcp.f32 %v2031_v54 }
0x1c3a   :  { %v2479_v7 = vpop.eup %2478 }
0x1c3b   :  { %v2037_v37 = vmul.f32 2.0, %v2479_v7  ;;  %v2481_v6 = vpop.eup %2480 }
0x1c3c   :  { %v2039_v11 = vmul.f32 %v2481_v6, %v1944_v16 }
0x1c3d   :  { %v2314_v49 = vadd.f32 -1.0, %v2037_v37 }
0x1c3f   :  { %v2040_v39 = vmul.f32 %v2481_v6, %v2314_v49 }
0x1c41   :  { %2042 = vrot.lane.b32.xlu1 %v2040_v39, %s2633_s26 }
0x1cb3   :  { %v2043_v26 = vpop.permute.xlu1 %2042 }
0x1cb4   :  { %v2045_v63 = vadd.f32 %v2043_v26, %v2039_v11 }
0x1cb6   :  { %2482 = vtanh.f32 %v2045_v63 }
0x1cc3   :  { %v2483_v55 = vpop.eup %2482 }
0x1cc4   :  { %v3522_v41 = vmul.f32 %v2483_v55, %v2479_v7 }
0x1cc6   :  { %2049 = vrot.lane.b32.xlu0 %v3522_v41, %s2633_s26 }
0x1cca   :  { %2149 = vrot.lane.b32.xlu0 %v3353_v10, %s2632_s5 }
0x1cce   :  { %2169 = vrot.lane.b32.xlu0 %v3474_v34, %s2632_s5 }
0x1cd2   :  { %2164 = vrot.lane.b32.xlu0 %v3442_v1, %s2632_s5 }
0x1cd6   :  { %2159 = vrot.lane.b32.xlu0 %v3409_v20, %s2632_s5 }
0x1d38   :  { %v2050_v25 = vpop.permute.xlu0 %2049 }
0x1d39   :  { %2315 = vmatmul.mubr.msk.f32.vlgmr.msra.gmra.mxu1 %vm321_vm3, %v2050_v25 }
0x1d3c   :  { %v2150_v15 = vpop.permute.xlu0 %2149 }
0x1d3d   :  { %v2152_v45 = vadd.f32 %v2150_v15, %v3353_v10  ;;  %v3591_v10 = vsel %vm2823_vm1, %v3322_v43, %v3320_v9 }
0x1d3f   :  { %v2153_v44 = vmul.f32 0.5, %v2152_v45 }
0x1d40   :  { %v2170_v35 = vpop.permute.xlu0 %2169 }
0x1d41   :  { %v2172_v60 = vadd.f32 %v2170_v35, %v3474_v34  ;;  %2191 = vrot.lane.b32.xlu0 %v2153_v44, %s2633_s26 }
0x1d43   :  { %v2173_v61 = vmul.f32 0.5, %v2172_v60 }
0x1d44   :  { %v2165_v59 = vpop.permute.xlu0 %2164 }
0x1d45   :  { %v2167_v62 = vadd.f32 %v2165_v59, %v3442_v1  ;;  %2203 = vrot.lane.b32.xlu0 %v2173_v61, %s2633_s26 }
0x1d47   :  { %v2168_v18 = vmul.f32 0.5, %v2167_v62 }
0x1d48   :  { %v2160_v16 = vpop.permute.xlu0 %2159 }
0x1d49   :  { %2199 = vrot.lane.b32.xlu0 %v2168_v18, %s2635_s29  ;;  %v2162_v19 = vadd.f32 %v2160_v16, %v3409_v20 }
0x1d4b   :  { %v2163_v4 = vmul.f32 0.5, %v2162_v19 }
0x1db3   :  { %v2192_v2 = vpop.permute.xlu0 %2191 }
0x1df9   :  { %v2119_v21 = vpop.f32.mrf.mxu1 }
0x1dfa   :  { %v2124_v33 = vadd.f32 %v2119_v21, %v3591_v10 }
0x1dfb   :  { %v2121_v0 = vpop.f32.mrf.mxu1 }
0x1dfc   :  { %v2316_v34 = vmul.f32 -1.442695, %v2124_v33  ;;  %v2125_v1 = vadd.f32 %v2121_v0, %v3592_v36 }
0x1dfe   :  { %v2317_v42 = vmul.f32 -1.442695, %v2125_v1  ;;  %2484 = vpow2.f32 %v2316_v34 }
0x1e00   :  { %2486 = vpow2.f32 %v2317_v42 }
0x1e0b   :  { %v2485_v40 = vpop.eup %2484 }
0x1e0c   :  { %v2132_v23 = vadd.f32 1.0, %v2485_v40 }
0x1e0d   :  { %v2487_v5 = vpop.eup %2486 }
0x1e0e   :  { %v2133_v22 = vadd.f32 1.0, %v2487_v5 }
0x1e10   :  { %2488 = vrcp.f32 %v2133_v22 }
0x1e11   :  { %2490 = vrcp.f32 %v2132_v23 }
0x1e1d   :  { %v2489_v47 = vpop.eup %2488 }
0x1e1e   :  { %v2138_v9 = vmul.f32 2.0, %v2489_v47  ;;  %v2491_v29 = vpop.eup %2490 }
0x1e1f   :  { %v2140_v52 = vmul.f32 %v2491_v29, %v2045_v63 }
0x1e20   :  { %v2318_v43 = vadd.f32 -1.0, %v2138_v9 }
0x1e22   :  { %v2141_v53 = vmul.f32 %v2491_v29, %v2318_v43 }
0x1e24   :  { %2143 = vrot.lane.b32.xlu1 %v2141_v53, %s2633_s26 }
0x1e28   :  { %2154 = vrot.lane.b32.xlu1 %v3376_v13, %s2632_s5 }
0x1e2c   :  { %2174 = vrot.lane.b32.xlu1 %v3506_v24, %s2632_s5 }
0x1e96   :  { %v2144_v12 = vpop.permute.xlu1 %2143 }
0x1e97   :  { %v2146_v57 = vadd.f32 %v2144_v12, %v2140_v52 }
0x1e99   :  { %2492 = vtanh.f32 %v2146_v57 }
0x1e9a   :  { %v2155_v50 = vpop.permute.xlu1 %2154 }
0x1e9b   :  { %v2157_v28 = vadd.f32 %v2155_v50, %v3376_v13  ;;  %v2204_v13 = vpop.permute.xlu0 %2203 }
0x1e9d   :  { %v2158_v3 = vmul.f32 0.5, %v2157_v28 }
0x1e9e   :  { %v2175_v51 = vpop.permute.xlu1 %2174 }
0x1e9f   :  { %v2177_v56 = vadd.f32 %v2175_v51, %v3506_v24  ;;  %v2200_v32 = vpop.permute.xlu0 %2199 }
0x1ea1   :  { %v2178_v14 = vmul.f32 0.5, %v2177_v56 }
0x1ea6   :  { %v2493_v30 = vpop.eup %2492 }
0x1ea7   :  { %v2148_v27 = vmul.f32 %v2493_v30, %v2489_v47 }
0x1ea9   :  { %2185 = vrot.lane.b32.xlu1 %v2148_v27, %s2632_s5 }
0x1ead   :  { %2179 = vrot.lane.b32.xlu1 %v3522_v41, %s2632_s5 }
0x1eb1   :  { %2195 = vrot.lane.b32.xlu1 %v2158_v3, %s2632_s5 }
0x1eb5   :  { %2207 = vrot.lane.b32.xlu1 %v2178_v14, %s2632_s5 }
0x1f1b   :  { %v2186_v46 = vpop.permute.xlu1 %2185 }
0x1f1c   :  { %v2188_v31 = vadd.f32 %v2186_v46, %v2148_v27 }
0x1f1e   :  { %v2189_v58 = vmul.f32 0.5, %v2188_v31 }
0x1f1f   :  { %v2180_v8 = vpop.permute.xlu1 %2179 }
0x1f20   :  { %2211 = vrot.lane.b32.xlu1 %v2189_v58, %s2635_s29  ;;  %v2182_v24 = vadd.f32 %v2180_v8, %v3522_v41 }
0x1f22   :  { %v2183_v7 = vmul.f32 0.5, %v2182_v24 }
0x1f23   :  { %v2196_v17 = vpop.permute.xlu1 %2195 }
0x1f24   :  { %v2215_v38 = vsel %vm2214_vm5, %v2192_v2, %v2196_v17 }
0x1f25   :  { %v2216_v48 = vsel %vm321_vm3, %v2215_v38, %v2163_v4 }
0x1f26   :  { %v2218_v54 = vsel %vm2217_vm6, %v2216_v48, %v2200_v32 }
0x1f27   :  { %v2208_v37 = vpop.permute.xlu1 %2207  ;;  %2222 = vst [vmem:[#allocation11] sm:$0xff] %v2218_v54 }
0x1f28   :  { %v2219_v49 = vsel %vm2214_vm5, %v2204_v13, %v2208_v37 }
0x1f29   :  { %v2220_v20 = vsel %vm321_vm3, %v2219_v49, %v2183_v7 }
0x1f92   :  { %v2212_v6 = vpop.permute.xlu1 %2211 }
0x1f93   :  { %v2221_v39 = vsel %vm2217_vm6, %v2220_v20, %v2212_v6 }
0x1f94   :  { %2223 = vst [vmem:[#allocation11 + $0x8] sm:$0xff] %v2221_v39 }
0x1f95   :  { %2605 = shalt.err (!%p2602_p1)
}
0x1f96   :  { %2233 = dma.vmem_to_hbm [thread:$0]  %s2231_s9, 256, %s3578_s7, [#allocation4]  }
0x1f97   :  { %2620 = dma.done.wait [#allocation4], 256  }
0x1f98   :  { %2621 = vsyncadd [#allocation4], 4294967040 }
0x1f99   :  { %2237 = vsyncpa [#allocation3], 1 }
0x1f9a   :  { %2238 = vsyncpa [#allocation6], 1 }
0x1f9b   :  { %2239 = vsyncpa [#allocation9], 1 }
0x1f9c   :  { %2240 = vsyncpa [#allocation4], 1 }

</bundles_post_ra>
